<compile_context>
chip_gen: v7x
topology: tpu7x:2x2x1
jax: 0.10.0
libtpu: 0.0.40
codegen_flags: <defaults>
</compile_context>

<pallas_src>
import numpy as np
import jax
import jax.numpy as jnp
from jax.experimental import pallas as pl
from jax.experimental.pallas import tpu as pltpu

EPS = 1e-5


def _fold_bn(gamma, beta, mean, var):
    scale = gamma / jnp.sqrt(var + EPS)
    bias = beta - mean * scale
    return scale, bias


def _out_size(n, pad):
    return (n + 2 * pad - 3) // 2 + 1


# ------------------------------- fused kernel -------------------------------

def _make_fused_kernel(Ho1, Wo1, C1, Ho2, Wo2, C2, Ho3, Wo3, C3):
    Hh1, Wq1 = (Ho1 + 1) // 2, (Wo1 + 1) // 2      # parity-plane extents (== Ho2, Wo2)
    HW1 = Hh1 * Wq1
    assert (Hh1, Wq1) == (Ho2, Wo2)
    # For tap index k in {0,1,2} of a stride-2 / pad-1 conv read from a 2-parity
    # decomposition that carries one leading zero-pad position:
    #   (parity plane, unit-stride offset inside that plane)
    SEL = ((1, 0), (0, 1), (1, 1))

    def kernel(a1_ref, w27_ref, b1_ref, w2dw_ref, b2dw_ref, w2pw_ref, b2pw_ref,
               w3dw_ref, b3dw_ref, w3bd_ref, b3bd_ref, o_ref, y1_ref, y2_ref):
        # ---------------- stage 1: 3x3 s2 conv (3 -> C1) + BN + ReLU ----------
        # One K=27 dot.  a1 rows are ordered (row-parity, col-parity, a, m), so
        # the result is already the 4-plane parity decomposition stage 2 reads.
        y1_ref[...] = jnp.zeros_like(y1_ref)          # zero-pad border positions
        y1 = jnp.dot(a1_ref[0], w27_ref[...], preferred_element_type=jnp.float32)
        y1 = jnp.maximum(y1 + b1_ref[...], 0.0)       # (4*HW1, C1)
        for rp in range(2):
            for cp in range(2):
                cls = rp * 2 + cp
                rh = (Ho1 - rp + 1) // 2              # real rows in this plane
                rw = (Wo1 - cp + 1) // 2              # real cols in this plane
                blk = y1[cls * HW1:(cls + 1) * HW1].reshape(Hh1, Wq1, C1)
                y1_ref[cls, 1:1 + rh, 1:1 + rw, :] = blk[:rh, :rw, :]

        # ------- stage 2: DW 3x3 s2 p1 + BN + ReLU, then PW 1x1 + BN + ReLU ----
        acc = None
        for ky in range(3):
            rp, ro = SEL[ky]
            for kx in range(3):
                cp, co = SEL[kx]
                tap = y1_ref[rp * 2 + cp, ro:ro + Ho2, co:co + Wo2, :]  # (Ho2,Wo2,C1)
                term = tap * w2dw_ref[ky * 3 + kx]
                acc = term if acc is None else acc + term
        dw = jnp.maximum(acc + b2dw_ref[0], 0.0)
        y2 = jnp.dot(dw.reshape(Ho2 * Wo2, C1), w2pw_ref[...],
                     preferred_element_type=jnp.float32)
        y2 = jnp.maximum(y2 + b2pw_ref[...], 0.0)     # (Ho2*Wo2, C2)
        y2_ref[...] = jnp.zeros_like(y2_ref)
        y2_ref[1:1 + Ho2, 1:1 + Wo2, :] = y2.reshape(Ho2, Wo2, C2)

        # ------- stage 3: DW 3x3 s2 p1 + BN + ReLU, then PW 1x1 + BN + ReLU ----
        # Depthwise at stride 1 over the tiny padded stage-2 output; the real
        # stride-2 samples are gathered with static slices and packed along the
        # lane axis, so the block-diagonal pointwise dot stores 256-lane rows.
        acc = None
        for ky in range(3):
            for kx in range(3):
                tap = y2_ref[ky:ky + Ho2, kx:kx + Wo2, :]               # (Ho2,Wo2,C2)
                term = tap * w3dw_ref[ky * 3 + kx]
                acc = term if acc is None else acc + term
        dw = jnp.maximum(acc + b3dw_ref[0], 0.0)      # stride-1 "virtual" grid
        rows = jnp.concatenate([dw[2 * i:2 * i + 1] for i in range(Ho3)], axis=0)
        packed = jnp.concatenate([rows[:, 2 * j, :] for j in range(Wo3)], axis=-1)
        out = jnp.dot(packed, w3bd_ref[...], preferred_element_type=jnp.float32)
        out = jnp.maximum(out + b3bd_ref[...], 0.0)   # (Ho3, Wo3*C3)
        o_ref[0] = out.astype(o_ref.dtype)

    return kernel


# ------------------------------- glue (JAX) ----------------------------------

def learning_to_downsample_pallas(x_nchw, p):
    x = jnp.transpose(x_nchw, (0, 2, 3, 1)).astype(jnp.float32)        # NCHW -> NHWC
    N, H, W, Cin = x.shape
    C1, C2, C3 = p['w1'].shape[0], p['pw1'].shape[0], p['pw2'].shape[0]

    Ho1, Wo1 = _out_size(H, 0), _out_size(W, 0)
    Ho2, Wo2 = _out_size(Ho1, 1), _out_size(Wo1, 1)
    Ho3, Wo3 = _out_size(Ho2, 1), _out_size(Wo2, 1)
    Hh1, Wq1 = (Ho1 + 1) // 2, (Wo1 + 1) // 2
    M1 = 4 * Hh1 * Wq1

    # stage-1 im2col, ordered (row-parity, col-parity, a, m); touches only the
    # raw 3-channel input (one cheap XLA gather, as endorsed by the review).
    Ho1p, Wo1p = 2 * Hh1, 2 * Wq1
    Hp, Wp = 2 * Ho1p + 2, 2 * Wo1p + 2
    xp = jnp.pad(x, ((0, 0), (0, Hp - H), (0, Wp - W), (0, 0)))
    taps = [xp[:, ky:ky + 2 * Ho1p:2, kx:kx + 2 * Wo1p:2, :]
            for ky in range(3) for kx in range(3)]                     # 9 x (N,Ho1p,Wo1p,Cin)
    t9 = jnp.concatenate(taps, axis=-1)                                # (N,Ho1p,Wo1p,9*Cin)
    t9 = t9.reshape(N, Hh1, 2, Wq1, 2, 9 * Cin)
    a1 = jnp.transpose(t9, (0, 2, 4, 1, 3, 5)).reshape(N, M1, 9 * Cin)

    # fold BN scales into conv weights (inference-mode running statistics)
    s1, b1 = _fold_bn(*p['bn1'])
    w27 = jnp.transpose(p['w1'], (2, 3, 1, 0)).reshape(9 * Cin, C1) * s1[None, :]

    s2d, b2d = _fold_bn(*p['bn_dw1'])
    w2dw = jnp.transpose(p['dw1'][:, 0], (1, 2, 0)).reshape(9, C1) * s2d[None, :]
    s2p, b2p = _fold_bn(*p['bn_pw1'])
    w2pw = jnp.transpose(p['pw1'][:, :, 0, 0], (1, 0)) * s2p[None, :]

    s3d, b3d = _fold_bn(*p['bn_dw2'])
    w3dw = jnp.transpose(p['dw2'][:, 0], (1, 2, 0)).reshape(9, C2) * s3d[None, :]
    s3p, b3p = _fold_bn(*p['bn_pw2'])
    w3pw = jnp.transpose(p['pw2'][:, :, 0, 0], (1, 0)) * s3p[None, :]
    w3bd = jnp.kron(jnp.eye(Wo3, dtype=jnp.float32), w3pw)             # (Wo3*C2, Wo3*C3)
    b3bd = jnp.tile(b3p, Wo3)                                          # (Wo3*C3,)

    kernel = _make_fused_kernel(Ho1, Wo1, C1, Ho2, Wo2, C2, Ho3, Wo3, C3)
    out = pl.pallas_call(
        kernel,
        out_shape=jax.ShapeDtypeStruct((N, Ho3, Wo3 * C3), jnp.float32),
        grid=(N,),
        in_specs=[
            pl.BlockSpec((1, M1, 9 * Cin), lambda n: (n, 0, 0)),       # a1
            pl.BlockSpec((9 * Cin, C1), lambda n: (0, 0)),             # w27
            pl.BlockSpec((1, C1), lambda n: (0, 0)),                   # b1
            pl.BlockSpec((9, 1, C1), lambda n: (0, 0, 0)),             # w2 depthwise
            pl.BlockSpec((1, 1, C1), lambda n: (0, 0, 0)),             # b2 depthwise
            pl.BlockSpec((C1, C2), lambda n: (0, 0)),                  # w2 pointwise
            pl.BlockSpec((1, C2), lambda n: (0, 0)),                   # b2 pointwise
            pl.BlockSpec((9, 1, C2), lambda n: (0, 0, 0)),             # w3 depthwise
            pl.BlockSpec((1, 1, C2), lambda n: (0, 0, 0)),             # b3 depthwise
            pl.BlockSpec((Wo3 * C2, Wo3 * C3), lambda n: (0, 0)),      # w3 pointwise (block-diag)
            pl.BlockSpec((1, Wo3 * C3), lambda n: (0, 0)),             # b3 pointwise (tiled)
        ],
        out_specs=pl.BlockSpec((1, Ho3, Wo3 * C3), lambda n: (n, 0, 0)),
        scratch_shapes=[
            pltpu.VMEM((4, Ho2 + 2, Wo2 + 2, C1), jnp.float32),        # stage-1 parity planes
            pltpu.VMEM((Ho2 + 2, Wo2 + 2, C2), jnp.float32),           # padded stage-2 output
        ],
        compiler_params=pltpu.CompilerParams(
            dimension_semantics=("parallel",),
            vmem_limit_bytes=32 * 1024 * 1024),
    )(a1, w27, b1.reshape(1, C1),
      w2dw.reshape(9, 1, C1), b2d.reshape(1, 1, C1), w2pw, b2p.reshape(1, C2),
      w3dw.reshape(9, 1, C2), b3d.reshape(1, 1, C2), w3bd, b3bd.reshape(1, Wo3 * C3))

    out = out.reshape(N, Ho3, Wo3, C3)
    return jnp.transpose(out, (0, 3, 1, 2))                            # NHWC -> NCHW


# --------------------------- parameters / reference --------------------------

def init_params(key):
    ks = jax.random.split(key, 10)

    def conv_w(k, shape, fan_in):
        return jax.random.normal(k, shape, jnp.float32) / np.sqrt(fan_in)

    def bn(k, c):
        k1, k2, k3, k4 = jax.random.split(k, 4)
        gamma = jax.random.uniform(k1, (c,), jnp.float32, 0.5, 1.5)
        beta = jax.random.normal(k2, (c,), jnp.float32) * 0.1
        mean = jax.random.normal(k3, (c,), jnp.float32) * 0.1
        var = jax.random.uniform(k4, (c,), jnp.float32, 0.5, 1.5)
        return gamma, beta, mean, var

    p = {}
    p['w1'] = conv_w(ks[0], (32, 3, 3, 3), 27)       # OIHW
    p['bn1'] = bn(ks[1], 32)
    p['dw1'] = conv_w(ks[2], (32, 1, 3, 3), 9)       # depthwise OIHW (groups=32)
    p['bn_dw1'] = bn(ks[3], 32)
    p['pw1'] = conv_w(ks[4], (48, 32, 1, 1), 32)
    p['bn_pw1'] = bn(ks[5], 48)
    p['dw2'] = conv_w(ks[6], (48, 1, 3, 3), 9)
    p['bn_dw2'] = bn(ks[7], 48)
    p['pw2'] = conv_w(ks[8], (64, 48, 1, 1), 48)
    p['bn_pw2'] = bn(ks[9], 64)
    return p


def reference_forward(x_nchw, p):
    def convbnrelu(x, w, bn, stride, pad, groups=1):
        y = jax.lax.conv_general_dilated(
            x, w, (stride, stride), [(pad, pad), (pad, pad)],
            dimension_numbers=('NCHW', 'OIHW', 'NCHW'),
            feature_group_count=groups,
            precision=jax.lax.Precision.HIGHEST)
        s, b = _fold_bn(*bn)
        y = y * s[None, :, None, None] + b[None, :, None, None]
        return jnp.maximum(y, 0.0)

    x = convbnrelu(x_nchw, p['w1'], p['bn1'], 2, 0)
    x = convbnrelu(x, p['dw1'], p['bn_dw1'], 2, 1, groups=32)
    x = convbnrelu(x, p['pw1'], p['bn_pw1'], 1, 0)
    x = convbnrelu(x, p['dw2'], p['bn_dw2'], 2, 1, groups=48)
    x = convbnrelu(x, p['pw2'], p['bn_pw2'], 1, 0)
    return x


# ----------------------------------- main ------------------------------------

if __name__ == "__main__":
    key = jax.random.PRNGKey(0)
    kx, kp = jax.random.split(key)
    x = jax.random.normal(kx, (2, 3, 32, 32), jnp.float32)   # NCHW like PyTorch
    params = init_params(kp)

    out = jax.jit(learning_to_downsample_pallas)(x, params)
    out = jax.block_until_ready(out)

    assert out.shape == (2, 64, 4, 4), out.shape
    ref = reference_forward(x, params)
    np.testing.assert_allclose(np.asarray(out), np.asarray(ref), rtol=2e-2, atol=2e-3)

    print("KERNEL_OK")
</pallas_src>

<mosaic_0001>
module attributes {stable_mosaic.version = 11 : i64} {
  func.func @kernel(%arg0: i32, %arg1: memref<1x256x27xf32, #tpu.memory_space<vmem>>, %arg2: memref<27x32xf32, #tpu.memory_space<vmem>>, %arg3: memref<1x32xf32, #tpu.memory_space<vmem>>, %arg4: memref<9x1x32xf32, #tpu.memory_space<vmem>>, %arg5: memref<1x1x32xf32, #tpu.memory_space<vmem>>, %arg6: memref<32x48xf32, #tpu.memory_space<vmem>>, %arg7: memref<1x48xf32, #tpu.memory_space<vmem>>, %arg8: memref<9x1x48xf32, #tpu.memory_space<vmem>>, %arg9: memref<1x1x48xf32, #tpu.memory_space<vmem>>, %arg10: memref<192x256xf32, #tpu.memory_space<vmem>>, %arg11: memref<1x256xf32, #tpu.memory_space<vmem>>, %arg12: memref<1x4x256xf32, #tpu.memory_space<vmem>>, %arg13: memref<4x10x10x32xf32, #tpu.memory_space<vmem>>, %arg14: memref<10x10x48xf32, #tpu.memory_space<vmem>>) attributes {dimension_semantics = [#tpu.dimension_semantics<parallel>], iteration_bounds = array<i64: 2>, scalar_prefetch = 0 : i64, scratch_operands = 2 : i64, tpu.core_type = #tpu.core_type<tc>, window_params = [{transform_indices = @transform_0, window_bounds = array<i64: 1, 256, 27>}, {pipeline_mode = #tpu.pipeline_mode<synchronous>, transform_indices = @transform_1, window_bounds = array<i64: 27, 32>}, {pipeline_mode = #tpu.pipeline_mode<synchronous>, transform_indices = @transform_2, window_bounds = array<i64: 1, 32>}, {pipeline_mode = #tpu.pipeline_mode<synchronous>, transform_indices = @transform_3, window_bounds = array<i64: 9, 1, 32>}, {pipeline_mode = #tpu.pipeline_mode<synchronous>, transform_indices = @transform_4, window_bounds = array<i64: 1, 1, 32>}, {pipeline_mode = #tpu.pipeline_mode<synchronous>, transform_indices = @transform_5, window_bounds = array<i64: 32, 48>}, {pipeline_mode = #tpu.pipeline_mode<synchronous>, transform_indices = @transform_6, window_bounds = array<i64: 1, 48>}, {pipeline_mode = #tpu.pipeline_mode<synchronous>, transform_indices = @transform_7, window_bounds = array<i64: 9, 1, 48>}, {pipeline_mode = #tpu.pipeline_mode<synchronous>, transform_indices = @transform_8, window_bounds = array<i64: 1, 1, 48>}, {pipeline_mode = #tpu.pipeline_mode<synchronous>, transform_indices = @transform_9, window_bounds = array<i64: 192, 256>}, {pipeline_mode = #tpu.pipeline_mode<synchronous>, transform_indices = @transform_10, window_bounds = array<i64: 1, 256>}, {transform_indices = @transform_11, window_bounds = array<i64: 1, 4, 256>}]} {
    %cst = arith.constant 0.000000e+00 : f32
    %0 = vector.broadcast %cst : f32 to vector<4x10x10x32xf32>
    %c0 = arith.constant 0 : index
    %c0_0 = arith.constant 0 : index
    %c0_1 = arith.constant 0 : index
    %c0_2 = arith.constant 0 : index
    %1 = vector.load %arg13[%c0, %c0_0, %c0_1, %c0_2] : memref<4x10x10x32xf32, #tpu.memory_space<vmem>>, vector<4x10x10x32xf32>
    tpu.vector_store %arg13[%c0, %c0_0, %c0_1, %c0_2], %0 {strides = array<i32>} : memref<4x10x10x32xf32, #tpu.memory_space<vmem>>, vector<4x10x10x32xf32>,
    %c0_3 = arith.constant 0 : index
    %c0_4 = arith.constant 0 : index
    %c0_5 = arith.constant 0 : index
    %2 = vector.load %arg1[%c0_3, %c0_4, %c0_5] : memref<1x256x27xf32, #tpu.memory_space<vmem>>, vector<1x256x27xf32>
    %3 = vector.shape_cast %2 : vector<1x256x27xf32> to vector<256x27xf32>
    %c0_6 = arith.constant 0 : index
    %c0_7 = arith.constant 0 : index
    %4 = vector.load %arg2[%c0_6, %c0_7] : memref<27x32xf32, #tpu.memory_space<vmem>>, vector<27x32xf32>
    %cst_8 = arith.constant dense<0.000000e+00> : vector<256x32xf32>
    %5 = tpu.matmul %3, %4, %cst_8 {dimension_numbers = #tpu.dot_dimension_numbers<[1], [0], [0], [1], [0, 0, 1, 1], [], []>} : vector<256x27xf32>, vector<27x32xf32>, vector<256x32xf32> -> vector<256x32xf32>
    %c0_9 = arith.constant 0 : index
    %c0_10 = arith.constant 0 : index
    %6 = vector.load %arg3[%c0_9, %c0_10] : memref<1x32xf32, #tpu.memory_space<vmem>>, vector<1x32xf32>
    %7 = vector.broadcast %6 : vector<1x32xf32> to vector<256x32xf32>
    %8 = arith.addf %5, %7 : vector<256x32xf32>
    %cst_11 = arith.constant 0.000000e+00 : f32
    %9 = vector.broadcast %cst_11 : f32 to vector<256x32xf32>
    %10 = arith.maximumf %8, %9 : vector<256x32xf32>
    %11 = vector.extract_strided_slice %10 {offsets = [0, 0], sizes = [64, 32], strides = [1, 1]} : vector<256x32xf32> to vector<64x32xf32>
    %12 = vector.shape_cast %11 : vector<64x32xf32> to vector<8x8x32xf32>
    %c0_12 = arith.constant 0 : index
    %c1 = arith.constant 1 : index
    %c1_13 = arith.constant 1 : index
    %c0_14 = arith.constant 0 : index
    %13 = vector.load %arg13[%c0_12, %c1, %c1_13, %c0_14] : memref<4x10x10x32xf32, #tpu.memory_space<vmem>>, vector<1x8x8x32xf32>
    %14 = vector.shape_cast %13 : vector<1x8x8x32xf32> to vector<8x8x32xf32>
    %15 = vector.shape_cast %12 : vector<8x8x32xf32> to vector<1x8x8x32xf32>
    tpu.vector_store %arg13[%c0_12, %c1, %c1_13, %c0_14], %15 {strides = array<i32>} : memref<4x10x10x32xf32, #tpu.memory_space<vmem>>, vector<1x8x8x32xf32>,
    %16 = vector.extract_strided_slice %10 {offsets = [64, 0], sizes = [64, 32], strides = [1, 1]} : vector<256x32xf32> to vector<64x32xf32>
    %17 = vector.shape_cast %16 : vector<64x32xf32> to vector<8x8x32xf32>
    %18 = vector.extract_strided_slice %17 {offsets = [0, 0, 0], sizes = [8, 7, 32], strides = [1, 1, 1]} : vector<8x8x32xf32> to vector<8x7x32xf32>
    %c1_15 = arith.constant 1 : index
    %c1_16 = arith.constant 1 : index
    %c1_17 = arith.constant 1 : index
    %c0_18 = arith.constant 0 : index
    %19 = vector.load %arg13[%c1_15, %c1_16, %c1_17, %c0_18] : memref<4x10x10x32xf32, #tpu.memory_space<vmem>>, vector<1x8x7x32xf32>
    %20 = vector.shape_cast %19 : vector<1x8x7x32xf32> to vector<8x7x32xf32>
    %21 = vector.shape_cast %18 : vector<8x7x32xf32> to vector<1x8x7x32xf32>
    tpu.vector_store %arg13[%c1_15, %c1_16, %c1_17, %c0_18], %21 {strides = array<i32>} : memref<4x10x10x32xf32, #tpu.memory_space<vmem>>, vector<1x8x7x32xf32>,
    %22 = vector.extract_strided_slice %10 {offsets = [128, 0], sizes = [64, 32], strides = [1, 1]} : vector<256x32xf32> to vector<64x32xf32>
    %23 = vector.shape_cast %22 : vector<64x32xf32> to vector<8x8x32xf32>
    %24 = vector.extract_strided_slice %23 {offsets = [0, 0, 0], sizes = [7, 8, 32], strides = [1, 1, 1]} : vector<8x8x32xf32> to vector<7x8x32xf32>
    %c2 = arith.constant 2 : index
    %c1_19 = arith.constant 1 : index
    %c1_20 = arith.constant 1 : index
    %c0_21 = arith.constant 0 : index
    %25 = vector.load %arg13[%c2, %c1_19, %c1_20, %c0_21] : memref<4x10x10x32xf32, #tpu.memory_space<vmem>>, vector<1x7x8x32xf32>
    %26 = vector.shape_cast %25 : vector<1x7x8x32xf32> to vector<7x8x32xf32>
    %27 = vector.shape_cast %24 : vector<7x8x32xf32> to vector<1x7x8x32xf32>
    tpu.vector_store %arg13[%c2, %c1_19, %c1_20, %c0_21], %27 {strides = array<i32>} : memref<4x10x10x32xf32, #tpu.memory_space<vmem>>, vector<1x7x8x32xf32>,
    %28 = vector.extract_strided_slice %10 {offsets = [192, 0], sizes = [64, 32], strides = [1, 1]} : vector<256x32xf32> to vector<64x32xf32>
    %29 = vector.shape_cast %28 : vector<64x32xf32> to vector<8x8x32xf32>
    %30 = vector.extract_strided_slice %29 {offsets = [0, 0, 0], sizes = [7, 7, 32], strides = [1, 1, 1]} : vector<8x8x32xf32> to vector<7x7x32xf32>
    %c3 = arith.constant 3 : index
    %c1_22 = arith.constant 1 : index
    %c1_23 = arith.constant 1 : index
    %c0_24 = arith.constant 0 : index
    %31 = vector.load %arg13[%c3, %c1_22, %c1_23, %c0_24] : memref<4x10x10x32xf32, #tpu.memory_space<vmem>>, vector<1x7x7x32xf32>
    %32 = vector.shape_cast %31 : vector<1x7x7x32xf32> to vector<7x7x32xf32>
    %33 = vector.shape_cast %30 : vector<7x7x32xf32> to vector<1x7x7x32xf32>
    tpu.vector_store %arg13[%c3, %c1_22, %c1_23, %c0_24], %33 {strides = array<i32>} : memref<4x10x10x32xf32, #tpu.memory_space<vmem>>, vector<1x7x7x32xf32>,
    %c3_25 = arith.constant 3 : index
    %c0_26 = arith.constant 0 : index
    %c0_27 = arith.constant 0 : index
    %c0_28 = arith.constant 0 : index
    %34 = vector.load %arg13[%c3_25, %c0_26, %c0_27, %c0_28] : memref<4x10x10x32xf32, #tpu.memory_space<vmem>>, vector<1x8x8x32xf32>
    %35 = vector.shape_cast %34 : vector<1x8x8x32xf32> to vector<8x8x32xf32>
    %c0_29 = arith.constant 0 : index
    %c0_30 = arith.constant 0 : index
    %c0_31 = arith.constant 0 : index
    %36 = vector.load %arg4[%c0_29, %c0_30, %c0_31] : memref<9x1x32xf32, #tpu.memory_space<vmem>>, vector<1x1x32xf32>
    %37 = vector.shape_cast %36 : vector<1x1x32xf32> to vector<1x32xf32>
    %38 = vector.shape_cast %37 : vector<1x32xf32> to vector<1x1x32xf32>
    %39 = vector.broadcast %38 : vector<1x1x32xf32> to vector<8x8x32xf32>
    %40 = arith.mulf %35, %39 : vector<8x8x32xf32>
    %c2_32 = arith.constant 2 : index
    %c0_33 = arith.constant 0 : index
    %c1_34 = arith.constant 1 : index
    %c0_35 = arith.constant 0 : index
    %41 = vector.load %arg13[%c2_32, %c0_33, %c1_34, %c0_35] : memref<4x10x10x32xf32, #tpu.memory_space<vmem>>, vector<1x8x8x32xf32>
    %42 = vector.shape_cast %41 : vector<1x8x8x32xf32> to vector<8x8x32xf32>
    %c1_36 = arith.constant 1 : index
    %c0_37 = arith.constant 0 : index
    %c0_38 = arith.constant 0 : index
    %43 = vector.load %arg4[%c1_36, %c0_37, %c0_38] : memref<9x1x32xf32, #tpu.memory_space<vmem>>, vector<1x1x32xf32>
    %44 = vector.shape_cast %43 : vector<1x1x32xf32> to vector<1x32xf32>
    %45 = vector.shape_cast %44 : vector<1x32xf32> to vector<1x1x32xf32>
    %46 = vector.broadcast %45 : vector<1x1x32xf32> to vector<8x8x32xf32>
    %47 = arith.mulf %42, %46 : vector<8x8x32xf32>
    %48 = arith.addf %40, %47 : vector<8x8x32xf32>
    %c3_39 = arith.constant 3 : index
    %c0_40 = arith.constant 0 : index
    %c1_41 = arith.constant 1 : index
    %c0_42 = arith.constant 0 : index
    %49 = vector.load %arg13[%c3_39, %c0_40, %c1_41, %c0_42] : memref<4x10x10x32xf32, #tpu.memory_space<vmem>>, vector<1x8x8x32xf32>
    %50 = vector.shape_cast %49 : vector<1x8x8x32xf32> to vector<8x8x32xf32>
    %c2_43 = arith.constant 2 : index
    %c0_44 = arith.constant 0 : index
    %c0_45 = arith.constant 0 : index
    %51 = vector.load %arg4[%c2_43, %c0_44, %c0_45] : memref<9x1x32xf32, #tpu.memory_space<vmem>>, vector<1x1x32xf32>
    %52 = vector.shape_cast %51 : vector<1x1x32xf32> to vector<1x32xf32>
    %53 = vector.shape_cast %52 : vector<1x32xf32> to vector<1x1x32xf32>
    %54 = vector.broadcast %53 : vector<1x1x32xf32> to vector<8x8x32xf32>
    %55 = arith.mulf %50, %54 : vector<8x8x32xf32>
    %56 = arith.addf %48, %55 : vector<8x8x32xf32>
    %c1_46 = arith.constant 1 : index
    %c1_47 = arith.constant 1 : index
    %c0_48 = arith.constant 0 : index
    %c0_49 = arith.constant 0 : index
    %57 = vector.load %arg13[%c1_46, %c1_47, %c0_48, %c0_49] : memref<4x10x10x32xf32, #tpu.memory_space<vmem>>, vector<1x8x8x32xf32>
    %58 = vector.shape_cast %57 : vector<1x8x8x32xf32> to vector<8x8x32xf32>
    %c3_50 = arith.constant 3 : index
    %c0_51 = arith.constant 0 : index
    %c0_52 = arith.constant 0 : index
    %59 = vector.load %arg4[%c3_50, %c0_51, %c0_52] : memref<9x1x32xf32, #tpu.memory_space<vmem>>, vector<1x1x32xf32>
    %60 = vector.shape_cast %59 : vector<1x1x32xf32> to vector<1x32xf32>
    %61 = vector.shape_cast %60 : vector<1x32xf32> to vector<1x1x32xf32>
    %62 = vector.broadcast %61 : vector<1x1x32xf32> to vector<8x8x32xf32>
    %63 = arith.mulf %58, %62 : vector<8x8x32xf32>
    %64 = arith.addf %56, %63 : vector<8x8x32xf32>
    %c0_53 = arith.constant 0 : index
    %c1_54 = arith.constant 1 : index
    %c1_55 = arith.constant 1 : index
    %c0_56 = arith.constant 0 : index
    %65 = vector.load %arg13[%c0_53, %c1_54, %c1_55, %c0_56] : memref<4x10x10x32xf32, #tpu.memory_space<vmem>>, vector<1x8x8x32xf32>
    %66 = vector.shape_cast %65 : vector<1x8x8x32xf32> to vector<8x8x32xf32>
    %c4 = arith.constant 4 : index
    %c0_57 = arith.constant 0 : index
    %c0_58 = arith.constant 0 : index
    %67 = vector.load %arg4[%c4, %c0_57, %c0_58] : memref<9x1x32xf32, #tpu.memory_space<vmem>>, vector<1x1x32xf32>
    %68 = vector.shape_cast %67 : vector<1x1x32xf32> to vector<1x32xf32>
    %69 = vector.shape_cast %68 : vector<1x32xf32> to vector<1x1x32xf32>
    %70 = vector.broadcast %69 : vector<1x1x32xf32> to vector<8x8x32xf32>
    %71 = arith.mulf %66, %70 : vector<8x8x32xf32>
    %72 = arith.addf %64, %71 : vector<8x8x32xf32>
    %c1_59 = arith.constant 1 : index
    %c1_60 = arith.constant 1 : index
    %c1_61 = arith.constant 1 : index
    %c0_62 = arith.constant 0 : index
    %73 = vector.load %arg13[%c1_59, %c1_60, %c1_61, %c0_62] : memref<4x10x10x32xf32, #tpu.memory_space<vmem>>, vector<1x8x8x32xf32>
    %74 = vector.shape_cast %73 : vector<1x8x8x32xf32> to vector<8x8x32xf32>
    %c5 = arith.constant 5 : index
    %c0_63 = arith.constant 0 : index
    %c0_64 = arith.constant 0 : index
    %75 = vector.load %arg4[%c5, %c0_63, %c0_64] : memref<9x1x32xf32, #tpu.memory_space<vmem>>, vector<1x1x32xf32>
    %76 = vector.shape_cast %75 : vector<1x1x32xf32> to vector<1x32xf32>
    %77 = vector.shape_cast %76 : vector<1x32xf32> to vector<1x1x32xf32>
    %78 = vector.broadcast %77 : vector<1x1x32xf32> to vector<8x8x32xf32>
    %79 = arith.mulf %74, %78 : vector<8x8x32xf32>
    %80 = arith.addf %72, %79 : vector<8x8x32xf32>
    %c3_65 = arith.constant 3 : index
    %c1_66 = arith.constant 1 : index
    %c0_67 = arith.constant 0 : index
    %c0_68 = arith.constant 0 : index
    %81 = vector.load %arg13[%c3_65, %c1_66, %c0_67, %c0_68] : memref<4x10x10x32xf32, #tpu.memory_space<vmem>>, vector<1x8x8x32xf32>
    %82 = vector.shape_cast %81 : vector<1x8x8x32xf32> to vector<8x8x32xf32>
    %c6 = arith.constant 6 : index
    %c0_69 = arith.constant 0 : index
    %c0_70 = arith.constant 0 : index
    %83 = vector.load %arg4[%c6, %c0_69, %c0_70] : memref<9x1x32xf32, #tpu.memory_space<vmem>>, vector<1x1x32xf32>
    %84 = vector.shape_cast %83 : vector<1x1x32xf32> to vector<1x32xf32>
    %85 = vector.shape_cast %84 : vector<1x32xf32> to vector<1x1x32xf32>
    %86 = vector.broadcast %85 : vector<1x1x32xf32> to vector<8x8x32xf32>
    %87 = arith.mulf %82, %86 : vector<8x8x32xf32>
    %88 = arith.addf %80, %87 : vector<8x8x32xf32>
    %c2_71 = arith.constant 2 : index
    %c1_72 = arith.constant 1 : index
    %c1_73 = arith.constant 1 : index
    %c0_74 = arith.constant 0 : index
    %89 = vector.load %arg13[%c2_71, %c1_72, %c1_73, %c0_74] : memref<4x10x10x32xf32, #tpu.memory_space<vmem>>, vector<1x8x8x32xf32>
    %90 = vector.shape_cast %89 : vector<1x8x8x32xf32> to vector<8x8x32xf32>
    %c7 = arith.constant 7 : index
    %c0_75 = arith.constant 0 : index
    %c0_76 = arith.constant 0 : index
    %91 = vector.load %arg4[%c7, %c0_75, %c0_76] : memref<9x1x32xf32, #tpu.memory_space<vmem>>, vector<1x1x32xf32>
    %92 = vector.shape_cast %91 : vector<1x1x32xf32> to vector<1x32xf32>
    %93 = vector.shape_cast %92 : vector<1x32xf32> to vector<1x1x32xf32>
    %94 = vector.broadcast %93 : vector<1x1x32xf32> to vector<8x8x32xf32>
    %95 = arith.mulf %90, %94 : vector<8x8x32xf32>
    %96 = arith.addf %88, %95 : vector<8x8x32xf32>
    %c3_77 = arith.constant 3 : index
    %c1_78 = arith.constant 1 : index
    %c1_79 = arith.constant 1 : index
    %c0_80 = arith.constant 0 : index
    %97 = vector.load %arg13[%c3_77, %c1_78, %c1_79, %c0_80] : memref<4x10x10x32xf32, #tpu.memory_space<vmem>>, vector<1x8x8x32xf32>
    %98 = vector.shape_cast %97 : vector<1x8x8x32xf32> to vector<8x8x32xf32>
    %c8 = arith.constant 8 : index
    %c0_81 = arith.constant 0 : index
    %c0_82 = arith.constant 0 : index
    %99 = vector.load %arg4[%c8, %c0_81, %c0_82] : memref<9x1x32xf32, #tpu.memory_space<vmem>>, vector<1x1x32xf32>
    %100 = vector.shape_cast %99 : vector<1x1x32xf32> to vector<1x32xf32>
    %101 = vector.shape_cast %100 : vector<1x32xf32> to vector<1x1x32xf32>
    %102 = vector.broadcast %101 : vector<1x1x32xf32> to vector<8x8x32xf32>
    %103 = arith.mulf %98, %102 : vector<8x8x32xf32>
    %104 = arith.addf %96, %103 : vector<8x8x32xf32>
    %c0_83 = arith.constant 0 : index
    %c0_84 = arith.constant 0 : index
    %c0_85 = arith.constant 0 : index
    %105 = vector.load %arg5[%c0_83, %c0_84, %c0_85] : memref<1x1x32xf32, #tpu.memory_space<vmem>>, vector<1x1x32xf32>
    %106 = vector.shape_cast %105 : vector<1x1x32xf32> to vector<1x32xf32>
    %107 = vector.shape_cast %106 : vector<1x32xf32> to vector<1x1x32xf32>
    %108 = vector.broadcast %107 : vector<1x1x32xf32> to vector<8x8x32xf32>
    %109 = arith.addf %104, %108 : vector<8x8x32xf32>
    %cst_86 = arith.constant 0.000000e+00 : f32
    %110 = vector.broadcast %cst_86 : f32 to vector<8x8x32xf32>
    %111 = arith.maximumf %109, %110 : vector<8x8x32xf32>
    %112 = vector.shape_cast %111 : vector<8x8x32xf32> to vector<64x32xf32>
    %c0_87 = arith.constant 0 : index
    %c0_88 = arith.constant 0 : index
    %113 = vector.load %arg6[%c0_87, %c0_88] : memref<32x48xf32, #tpu.memory_space<vmem>>, vector<32x48xf32>
    %cst_89 = arith.constant dense<0.000000e+00> : vector<64x48xf32>
    %114 = tpu.matmul %112, %113, %cst_89 {dimension_numbers = #tpu.dot_dimension_numbers<[1], [0], [0], [1], [0, 0, 1, 1], [], []>} : vector<64x32xf32>, vector<32x48xf32>, vector<64x48xf32> -> vector<64x48xf32>
    %c0_90 = arith.constant 0 : index
    %c0_91 = arith.constant 0 : index
    %115 = vector.load %arg7[%c0_90, %c0_91] : memref<1x48xf32, #tpu.memory_space<vmem>>, vector<1x48xf32>
    %116 = vector.broadcast %115 : vector<1x48xf32> to vector<64x48xf32>
    %117 = arith.addf %114, %116 : vector<64x48xf32>
    %cst_92 = arith.constant 0.000000e+00 : f32
    %118 = vector.broadcast %cst_92 : f32 to vector<64x48xf32>
    %119 = arith.maximumf %117, %118 : vector<64x48xf32>
    %cst_93 = arith.constant 0.000000e+00 : f32
    %120 = vector.broadcast %cst_93 : f32 to vector<10x10x48xf32>
    %c0_94 = arith.constant 0 : index
    %c0_95 = arith.constant 0 : index
    %c0_96 = arith.constant 0 : index
    %121 = vector.load %arg14[%c0_94, %c0_95, %c0_96] : memref<10x10x48xf32, #tpu.memory_space<vmem>>, vector<10x10x48xf32>
    tpu.vector_store %arg14[%c0_94, %c0_95, %c0_96], %120 {strides = array<i32>} : memref<10x10x48xf32, #tpu.memory_space<vmem>>, vector<10x10x48xf32>,
    %122 = vector.shape_cast %119 : vector<64x48xf32> to vector<8x8x48xf32>
    %c1_97 = arith.constant 1 : index
    %c1_98 = arith.constant 1 : index
    %c0_99 = arith.constant 0 : index
    %123 = vector.load %arg14[%c1_97, %c1_98, %c0_99] : memref<10x10x48xf32, #tpu.memory_space<vmem>>, vector<8x8x48xf32>
    tpu.vector_store %arg14[%c1_97, %c1_98, %c0_99], %122 {strides = array<i32>} : memref<10x10x48xf32, #tpu.memory_space<vmem>>, vector<8x8x48xf32>,
    %c0_100 = arith.constant 0 : index
    %c0_101 = arith.constant 0 : index
    %c0_102 = arith.constant 0 : index
    %124 = vector.load %arg14[%c0_100, %c0_101, %c0_102] : memref<10x10x48xf32, #tpu.memory_space<vmem>>, vector<8x8x48xf32>
    %c0_103 = arith.constant 0 : index
    %c0_104 = arith.constant 0 : index
    %c0_105 = arith.constant 0 : index
    %125 = vector.load %arg8[%c0_103, %c0_104, %c0_105] : memref<9x1x48xf32, #tpu.memory_space<vmem>>, vector<1x1x48xf32>
    %126 = vector.shape_cast %125 : vector<1x1x48xf32> to vector<1x48xf32>
    %127 = vector.shape_cast %126 : vector<1x48xf32> to vector<1x1x48xf32>
    %128 = vector.broadcast %127 : vector<1x1x48xf32> to vector<8x8x48xf32>
    %129 = arith.mulf %124, %128 : vector<8x8x48xf32>
    %c0_106 = arith.constant 0 : index
    %c1_107 = arith.constant 1 : index
    %c0_108 = arith.constant 0 : index
    %130 = vector.load %arg14[%c0_106, %c1_107, %c0_108] : memref<10x10x48xf32, #tpu.memory_space<vmem>>, vector<8x8x48xf32>
    %c1_109 = arith.constant 1 : index
    %c0_110 = arith.constant 0 : index
    %c0_111 = arith.constant 0 : index
    %131 = vector.load %arg8[%c1_109, %c0_110, %c0_111] : memref<9x1x48xf32, #tpu.memory_space<vmem>>, vector<1x1x48xf32>
    %132 = vector.shape_cast %131 : vector<1x1x48xf32> to vector<1x48xf32>
    %133 = vector.shape_cast %132 : vector<1x48xf32> to vector<1x1x48xf32>
    %134 = vector.broadcast %133 : vector<1x1x48xf32> to vector<8x8x48xf32>
    %135 = arith.mulf %130, %134 : vector<8x8x48xf32>
    %136 = arith.addf %129, %135 : vector<8x8x48xf32>
    %c0_112 = arith.constant 0 : index
    %c2_113 = arith.constant 2 : index
    %c0_114 = arith.constant 0 : index
    %137 = vector.load %arg14[%c0_112, %c2_113, %c0_114] : memref<10x10x48xf32, #tpu.memory_space<vmem>>, vector<8x8x48xf32>
    %c2_115 = arith.constant 2 : index
    %c0_116 = arith.constant 0 : index
    %c0_117 = arith.constant 0 : index
    %138 = vector.load %arg8[%c2_115, %c0_116, %c0_117] : memref<9x1x48xf32, #tpu.memory_space<vmem>>, vector<1x1x48xf32>
    %139 = vector.shape_cast %138 : vector<1x1x48xf32> to vector<1x48xf32>
    %140 = vector.shape_cast %139 : vector<1x48xf32> to vector<1x1x48xf32>
    %141 = vector.broadcast %140 : vector<1x1x48xf32> to vector<8x8x48xf32>
    %142 = arith.mulf %137, %141 : vector<8x8x48xf32>
    %143 = arith.addf %136, %142 : vector<8x8x48xf32>
    %c1_118 = arith.constant 1 : index
    %c0_119 = arith.constant 0 : index
    %c0_120 = arith.constant 0 : index
    %144 = vector.load %arg14[%c1_118, %c0_119, %c0_120] : memref<10x10x48xf32, #tpu.memory_space<vmem>>, vector<8x8x48xf32>
    %c3_121 = arith.constant 3 : index
    %c0_122 = arith.constant 0 : index
    %c0_123 = arith.constant 0 : index
    %145 = vector.load %arg8[%c3_121, %c0_122, %c0_123] : memref<9x1x48xf32, #tpu.memory_space<vmem>>, vector<1x1x48xf32>
    %146 = vector.shape_cast %145 : vector<1x1x48xf32> to vector<1x48xf32>
    %147 = vector.shape_cast %146 : vector<1x48xf32> to vector<1x1x48xf32>
    %148 = vector.broadcast %147 : vector<1x1x48xf32> to vector<8x8x48xf32>
    %149 = arith.mulf %144, %148 : vector<8x8x48xf32>
    %150 = arith.addf %143, %149 : vector<8x8x48xf32>
    %c1_124 = arith.constant 1 : index
    %c1_125 = arith.constant 1 : index
    %c0_126 = arith.constant 0 : index
    %151 = vector.load %arg14[%c1_124, %c1_125, %c0_126] : memref<10x10x48xf32, #tpu.memory_space<vmem>>, vector<8x8x48xf32>
    %c4_127 = arith.constant 4 : index
    %c0_128 = arith.constant 0 : index
    %c0_129 = arith.constant 0 : index
    %152 = vector.load %arg8[%c4_127, %c0_128, %c0_129] : memref<9x1x48xf32, #tpu.memory_space<vmem>>, vector<1x1x48xf32>
    %153 = vector.shape_cast %152 : vector<1x1x48xf32> to vector<1x48xf32>
    %154 = vector.shape_cast %153 : vector<1x48xf32> to vector<1x1x48xf32>
    %155 = vector.broadcast %154 : vector<1x1x48xf32> to vector<8x8x48xf32>
    %156 = arith.mulf %151, %155 : vector<8x8x48xf32>
    %157 = arith.addf %150, %156 : vector<8x8x48xf32>
    %c1_130 = arith.constant 1 : index
    %c2_131 = arith.constant 2 : index
    %c0_132 = arith.constant 0 : index
    %158 = vector.load %arg14[%c1_130, %c2_131, %c0_132] : memref<10x10x48xf32, #tpu.memory_space<vmem>>, vector<8x8x48xf32>
    %c5_133 = arith.constant 5 : index
    %c0_134 = arith.constant 0 : index
    %c0_135 = arith.constant 0 : index
    %159 = vector.load %arg8[%c5_133, %c0_134, %c0_135] : memref<9x1x48xf32, #tpu.memory_space<vmem>>, vector<1x1x48xf32>
    %160 = vector.shape_cast %159 : vector<1x1x48xf32> to vector<1x48xf32>
    %161 = vector.shape_cast %160 : vector<1x48xf32> to vector<1x1x48xf32>
    %162 = vector.broadcast %161 : vector<1x1x48xf32> to vector<8x8x48xf32>
    %163 = arith.mulf %158, %162 : vector<8x8x48xf32>
    %164 = arith.addf %157, %163 : vector<8x8x48xf32>
    %c2_136 = arith.constant 2 : index
    %c0_137 = arith.constant 0 : index
    %c0_138 = arith.constant 0 : index
    %165 = vector.load %arg14[%c2_136, %c0_137, %c0_138] : memref<10x10x48xf32, #tpu.memory_space<vmem>>, vector<8x8x48xf32>
    %c6_139 = arith.constant 6 : index
    %c0_140 = arith.constant 0 : index
    %c0_141 = arith.constant 0 : index
    %166 = vector.load %arg8[%c6_139, %c0_140, %c0_141] : memref<9x1x48xf32, #tpu.memory_space<vmem>>, vector<1x1x48xf32>
    %167 = vector.shape_cast %166 : vector<1x1x48xf32> to vector<1x48xf32>
    %168 = vector.shape_cast %167 : vector<1x48xf32> to vector<1x1x48xf32>
    %169 = vector.broadcast %168 : vector<1x1x48xf32> to vector<8x8x48xf32>
    %170 = arith.mulf %165, %169 : vector<8x8x48xf32>
    %171 = arith.addf %164, %170 : vector<8x8x48xf32>
    %c2_142 = arith.constant 2 : index
    %c1_143 = arith.constant 1 : index
    %c0_144 = arith.constant 0 : index
    %172 = vector.load %arg14[%c2_142, %c1_143, %c0_144] : memref<10x10x48xf32, #tpu.memory_space<vmem>>, vector<8x8x48xf32>
    %c7_145 = arith.constant 7 : index
    %c0_146 = arith.constant 0 : index
    %c0_147 = arith.constant 0 : index
    %173 = vector.load %arg8[%c7_145, %c0_146, %c0_147] : memref<9x1x48xf32, #tpu.memory_space<vmem>>, vector<1x1x48xf32>
    %174 = vector.shape_cast %173 : vector<1x1x48xf32> to vector<1x48xf32>
    %175 = vector.shape_cast %174 : vector<1x48xf32> to vector<1x1x48xf32>
    %176 = vector.broadcast %175 : vector<1x1x48xf32> to vector<8x8x48xf32>
    %177 = arith.mulf %172, %176 : vector<8x8x48xf32>
    %178 = arith.addf %171, %177 : vector<8x8x48xf32>
    %c2_148 = arith.constant 2 : index
    %c2_149 = arith.constant 2 : index
    %c0_150 = arith.constant 0 : index
    %179 = vector.load %arg14[%c2_148, %c2_149, %c0_150] : memref<10x10x48xf32, #tpu.memory_space<vmem>>, vector<8x8x48xf32>
    %c8_151 = arith.constant 8 : index
    %c0_152 = arith.constant 0 : index
    %c0_153 = arith.constant 0 : index
    %180 = vector.load %arg8[%c8_151, %c0_152, %c0_153] : memref<9x1x48xf32, #tpu.memory_space<vmem>>, vector<1x1x48xf32>
    %181 = vector.shape_cast %180 : vector<1x1x48xf32> to vector<1x48xf32>
    %182 = vector.shape_cast %181 : vector<1x48xf32> to vector<1x1x48xf32>
    %183 = vector.broadcast %182 : vector<1x1x48xf32> to vector<8x8x48xf32>
    %184 = arith.mulf %179, %183 : vector<8x8x48xf32>
    %185 = arith.addf %178, %184 : vector<8x8x48xf32>
    %c0_154 = arith.constant 0 : index
    %c0_155 = arith.constant 0 : index
    %c0_156 = arith.constant 0 : index
    %186 = vector.load %arg9[%c0_154, %c0_155, %c0_156] : memref<1x1x48xf32, #tpu.memory_space<vmem>>, vector<1x1x48xf32>
    %187 = vector.shape_cast %186 : vector<1x1x48xf32> to vector<1x48xf32>
    %188 = vector.shape_cast %187 : vector<1x48xf32> to vector<1x1x48xf32>
    %189 = vector.broadcast %188 : vector<1x1x48xf32> to vector<8x8x48xf32>
    %190 = arith.addf %185, %189 : vector<8x8x48xf32>
    %cst_157 = arith.constant 0.000000e+00 : f32
    %191 = vector.broadcast %cst_157 : f32 to vector<8x8x48xf32>
    %192 = arith.maximumf %190, %191 : vector<8x8x48xf32>
    %193 = vector.extract_strided_slice %192 {offsets = [0, 0, 0], sizes = [1, 8, 48], strides = [1, 1, 1]} : vector<8x8x48xf32> to vector<1x8x48xf32>
    %194 = vector.extract_strided_slice %192 {offsets = [2, 0, 0], sizes = [1, 8, 48], strides = [1, 1, 1]} : vector<8x8x48xf32> to vector<1x8x48xf32>
    %195 = vector.extract_strided_slice %192 {offsets = [4, 0, 0], sizes = [1, 8, 48], strides = [1, 1, 1]} : vector<8x8x48xf32> to vector<1x8x48xf32>
    %196 = vector.extract_strided_slice %192 {offsets = [6, 0, 0], sizes = [1, 8, 48], strides = [1, 1, 1]} : vector<8x8x48xf32> to vector<1x8x48xf32>
    %197 = tpu.concatenate %193, %194, %195, %196 in 0 : vector<1x8x48xf32>, vector<1x8x48xf32>, vector<1x8x48xf32>, vector<1x8x48xf32> -> vector<4x8x48xf32>
    %198 = vector.extract_strided_slice %197 {offsets = [0, 0, 0], sizes = [4, 1, 48], strides = [1, 1, 1]} : vector<4x8x48xf32> to vector<4x1x48xf32>
    %199 = vector.shape_cast %198 : vector<4x1x48xf32> to vector<4x48xf32>
    %200 = vector.extract_strided_slice %197 {offsets = [0, 2, 0], sizes = [4, 1, 48], strides = [1, 1, 1]} : vector<4x8x48xf32> to vector<4x1x48xf32>
    %201 = vector.shape_cast %200 : vector<4x1x48xf32> to vector<4x48xf32>
    %202 = vector.extract_strided_slice %197 {offsets = [0, 4, 0], sizes = [4, 1, 48], strides = [1, 1, 1]} : vector<4x8x48xf32> to vector<4x1x48xf32>
    %203 = vector.shape_cast %202 : vector<4x1x48xf32> to vector<4x48xf32>
    %204 = vector.extract_strided_slice %197 {offsets = [0, 6, 0], sizes = [4, 1, 48], strides = [1, 1, 1]} : vector<4x8x48xf32> to vector<4x1x48xf32>
    %205 = vector.shape_cast %204 : vector<4x1x48xf32> to vector<4x48xf32>
    %206 = tpu.concatenate %199, %201, %203, %205 in 1 : vector<4x48xf32>, vector<4x48xf32>, vector<4x48xf32>, vector<4x48xf32> -> vector<4x192xf32>
    %c0_158 = arith.constant 0 : index
    %c0_159 = arith.constant 0 : index
    %207 = vector.load %arg10[%c0_158, %c0_159] : memref<192x256xf32, #tpu.memory_space<vmem>>, vector<192x256xf32>
    %cst_160 = arith.constant dense<0.000000e+00> : vector<4x256xf32>
    %208 = tpu.matmul %206, %207, %cst_160 {dimension_numbers = #tpu.dot_dimension_numbers<[1], [0], [0], [1], [0, 0, 1, 1], [], []>} : vector<4x192xf32>, vector<192x256xf32>, vector<4x256xf32> -> vector<4x256xf32>
    %c0_161 = arith.constant 0 : index
    %c0_162 = arith.constant 0 : index
    %209 = vector.load %arg11[%c0_161, %c0_162] : memref<1x256xf32, #tpu.memory_space<vmem>>, vector<1x256xf32>
    %210 = vector.broadcast %209 : vector<1x256xf32> to vector<4x256xf32>
    %211 = arith.addf %208, %210 : vector<4x256xf32>
    %cst_163 = arith.constant 0.000000e+00 : f32
    %212 = vector.broadcast %cst_163 : f32 to vector<4x256xf32>
    %213 = arith.maximumf %211, %212 : vector<4x256xf32>
    %c0_164 = arith.constant 0 : index
    %c0_165 = arith.constant 0 : index
    %c0_166 = arith.constant 0 : index
    %214 = vector.load %arg12[%c0_164, %c0_165, %c0_166] : memref<1x4x256xf32, #tpu.memory_space<vmem>>, vector<1x4x256xf32>
    %215 = vector.shape_cast %214 : vector<1x4x256xf32> to vector<4x256xf32>
    %216 = vector.shape_cast %213 : vector<4x256xf32> to vector<1x4x256xf32>
    tpu.vector_store %arg12[%c0_164, %c0_165, %c0_166], %216 {strides = array<i32>} : memref<1x4x256xf32, #tpu.memory_space<vmem>>, vector<1x4x256xf32>,
    return
  }
  func.func @transform_0(%arg0: i32) -> (i32, i32, i32) {
    %c0_i32 = arith.constant 0 : i32
    %c0_i32_0 = arith.constant 0 : i32
    %c0_i32_1 = arith.constant 0 : i32
    return %arg0, %c0_i32, %c0_i32_0 : i32, i32, i32
  }
  func.func @transform_1(%arg0: i32) -> (i32, i32) {
    %c0_i32 = arith.constant 0 : i32
    %c0_i32_0 = arith.constant 0 : i32
    %c0_i32_1 = arith.constant 0 : i32
    return %c0_i32, %c0_i32_0 : i32, i32
  }
  func.func @transform_2(%arg0: i32) -> (i32, i32) {
    %c0_i32 = arith.constant 0 : i32
    %c0_i32_0 = arith.constant 0 : i32
    %c0_i32_1 = arith.constant 0 : i32
    return %c0_i32, %c0_i32_0 : i32, i32
  }
  func.func @transform_3(%arg0: i32) -> (i32, i32, i32) {
    %c0_i32 = arith.constant 0 : i32
    %c0_i32_0 = arith.constant 0 : i32
    %c0_i32_1 = arith.constant 0 : i32
    %c0_i32_2 = arith.constant 0 : i32
    return %c0_i32, %c0_i32_0, %c0_i32_1 : i32, i32, i32
  }
  func.func @transform_4(%arg0: i32) -> (i32, i32, i32) {
    %c0_i32 = arith.constant 0 : i32
    %c0_i32_0 = arith.constant 0 : i32
    %c0_i32_1 = arith.constant 0 : i32
    %c0_i32_2 = arith.constant 0 : i32
    return %c0_i32, %c0_i32_0, %c0_i32_1 : i32, i32, i32
  }
  func.func @transform_5(%arg0: i32) -> (i32, i32) {
    %c0_i32 = arith.constant 0 : i32
    %c0_i32_0 = arith.constant 0 : i32
    %c0_i32_1 = arith.constant 0 : i32
    return %c0_i32, %c0_i32_0 : i32, i32
  }
  func.func @transform_6(%arg0: i32) -> (i32, i32) {
    %c0_i32 = arith.constant 0 : i32
    %c0_i32_0 = arith.constant 0 : i32
    %c0_i32_1 = arith.constant 0 : i32
    return %c0_i32, %c0_i32_0 : i32, i32
  }
  func.func @transform_7(%arg0: i32) -> (i32, i32, i32) {
    %c0_i32 = arith.constant 0 : i32
    %c0_i32_0 = arith.constant 0 : i32
    %c0_i32_1 = arith.constant 0 : i32
    %c0_i32_2 = arith.constant 0 : i32
    return %c0_i32, %c0_i32_0, %c0_i32_1 : i32, i32, i32
  }
  func.func @transform_8(%arg0: i32) -> (i32, i32, i32) {
    %c0_i32 = arith.constant 0 : i32
    %c0_i32_0 = arith.constant 0 : i32
    %c0_i32_1 = arith.constant 0 : i32
    %c0_i32_2 = arith.constant 0 : i32
    return %c0_i32, %c0_i32_0, %c0_i32_1 : i32, i32, i32
  }
  func.func @transform_9(%arg0: i32) -> (i32, i32) {
    %c0_i32 = arith.constant 0 : i32
    %c0_i32_0 = arith.constant 0 : i32
    %c0_i32_1 = arith.constant 0 : i32
    return %c0_i32, %c0_i32_0 : i32, i32
  }
  func.func @transform_10(%arg0: i32) -> (i32, i32) {
    %c0_i32 = arith.constant 0 : i32
    %c0_i32_0 = arith.constant 0 : i32
    %c0_i32_1 = arith.constant 0 : i32
    return %c0_i32, %c0_i32_0 : i32, i32
  }
  func.func @transform_11(%arg0: i32) -> (i32, i32, i32) {
    %c0_i32 = arith.constant 0 : i32
    %c0_i32_0 = arith.constant 0 : i32
    %c0_i32_1 = arith.constant 0 : i32
    return %arg0, %c0_i32, %c0_i32_0 : i32, i32, i32
  }
}

</mosaic_0001>

<bundles_post_ra>
// kernel: tile.8
= control target key start
LH: loop header
LB: loop body
LE: loop exit
PB: predicated region body
PF: predicated region fallthrough
CT: control target
= control target key end

     0   :  { %s22_s0 = inlined_call_operand.vmem [shape: f32[64], index: 0, kind: input, shape index: {}]   ;;  %s23_s1 = inlined_call_operand.vmem [shape: f32[4,64], index: 1, kind: output, shape index: {}]  }
   0x1   :  { %v4_v0 = vld [vmem:[%s22_s0] ss:$0 sm:$0xff] }
   0x2   :  { %5 = vst [vmem:[%s23_s1] sm:$0xf] %v4_v0 }

// kernel: tile.9
= control target key start
LH: loop header
LB: loop body
LE: loop exit
PB: predicated region body
PF: predicated region fallthrough
CT: control target
= control target key end

     0   :  { %s6_s8 = smov 3  ;;  %vm8_vm0 = vcmask 523264   ;;  %s30_s9 = smov 64   ;;  %vm15_vm1 = vcmask 1048064   ;;  %s50_s0 = inlined_call_operand.vmem [shape: f32[4,64], index: 0, kind: input, shape index: {}]   ;;  %s51_s1 = inlined_call_operand.vmem [shape: f32[1,256], index: 1, kind: output, shape index: {}]  }
   0x1   :  { %v4_v0 = vld [vmem:[%s50_s0] sm:$0xf]  ;;  %s11_s0 = smov 3 }
   0x2   :  { %5 = vst [vmem:[#allocation1] sm:$0xf] %v4_v0 }
   0x9   :  { %v12_v1 = vld [vmem:[#allocation1 + $0x1] ss:$2 sm:%s11_s0]   ;;  %v7_v2 = vld [vmem:[#allocation1] ss:$2 sm:%s6_s8]  }
   0xa   :  { %13 = vrot.lane.b32.xlu0 %v12_v1, %s30_s9  ;;  %9 = vst.msk [vmem:[#allocation0] ss:$8 sm:$0x3] %vm8_vm0, %v7_v2  }
  0x7c   :  { %v14_v3 = vpop.permute.xlu0 %13  }
  0x7d   :  { %16 = vst.msk [vmem:[#allocation0] ss:$8 sm:$0x3] %vm15_vm1, %v14_v3  }
  0x84   :  { %v20_v4 = vld [vmem:[#allocation0] sm:$0x1]  ;;  %v24_v5 = vld [vmem:[#allocation0 + $0x8] sm:$0x1] }
  0x85   :  { %22 = vst [vmem:[%s51_s1] sm:$0x1] %v20_v4  ;;  %28 = vst [vmem:[%s51_s1 + $0x1] sm:$0x1] %v24_v5 }

// kernel: learning_to_downsample_pallas.1
= control target key start
LH: loop header
LB: loop body
LE: loop exit
PB: predicated region body
PF: predicated region fallthrough
CT: control target
= control target key end

     0   :  { %s2189_s17 = smov 0   ;;  %s3004_s0 = inlined_call_operand.vmem [shape: f32[2,256,27], index: 0, kind: input, shape index: {}]   ;;  %s3005_s1 = inlined_call_operand.vmem [shape: f32[27,32], index: 1, kind: input, shape index: {}]   ;;  %s3006_s2 = inlined_call_operand.vmem [shape: f32[1,32], index: 2, kind: input, shape index: {}]   ;;  %s3007_s3 = inlined_call_operand.vmem [shape: f32[9,1,32], index: 3, kind: input, shape index: {}]   ;;  %s3008_s4 = inlined_call_operand.vmem [shape: f32[1,1,32], index: 4, kind: input, shape index: {}]   ;;  %s3009_s5 = inlined_call_operand.vmem [shape: f32[32,48], index: 5, kind: input, shape index: {}]   ;;  %s3010_s6 = inlined_call_operand.vmem [shape: f32[1,48], index: 6, kind: input, shape index: {}]   ;;  %s3011_s7 = inlined_call_operand.vmem [shape: f32[9,1,48], index: 7, kind: input, shape index: {}]   ;;  %s3012_s8 = inlined_call_operand.vmem [shape: f32[1,1,48], index: 8, kind: input, shape index: {}]   ;;  %s3013_s9 = inlined_call_operand.vmem [shape: f32[192,256], index: 9, kind: input, shape index: {}]   ;;  %s3014_s10 = inlined_call_operand.vmem [shape: f32[1,256], index: 10, kind: input, shape index: {}]   ;;  %s3015_s11 = inlined_call_operand.vmem [shape: f32[2,4,256], index: 11, kind: output, shape index: {}]  }
   0x1 LB: > { %s1820_s18 = sadd.s32 4294967295, %s2122_s17   ;;  %p1824_p0 = scmp.ge.s32.totalorder %s2122_s17, 1  ;;  %s2122_s17 = sphi %s2189_s17, %s21_s17  }
   0x2   : > { %p337_p1 = scmp.lt.s32.totalorder %s2122_s17, 3 }
   0x4   : > { %p338_p2 = pnand %p1824_p0, %p337_p1 }
   0x5   : > { %v501_v0 = vld [vmem:[%s3005_s1] sm:$0xff] (!%p338_p2)  ;;  %v502_v1 = vld [vmem:[%s3005_s1 + $0x8] sm:$0xff] (!%p338_p2)  ;;  %v503_v2 = vld [vmem:[%s3005_s1 + $0x10] sm:$0xff] (!%p338_p2)  ;;  %vm609_vm0 = vcmask (!%p338_p2), 1042432   ;;  %p377_p3 = scmp.lt.s32.totalorder (!%p338_p2), %s1820_s18, 1  ;;  %vm387_vm1 = vcmask (!%p338_p2), 261120  }
   0x6   : > { %341 = sbr.rel (%p338_p2) target bundleno = 914 (0x392), region = 64  ;;  %v2206_v3 = vpack.c.bf16 (!%p338_p2), %v502_v1, %v501_v0  ;;  %v504_v4 = vld [vmem:[%s3005_s1 + $0x18] sm:$0x7] (!%p338_p2)  ;;  %vm2124_vm2 = vmmov (!%p338_p2), 1   ;;  %vm389_vm4 = vcmask (!%p338_p2), 254976   ;;  %v2125_v7 = vmov (!%p338_p2), 0.0  }
   0x7   : > { %v2211_v5 = vpack.c.bf16 (!%p338_p2), %v504_v4, %v503_v2  ;;  %vm2213_vm3 = vmpackc.low (!%p338_p2), %vm609_vm0, %vm2124_vm2  ;;  %393 = vst.msk [vmem:[#allocation2 + $0x20] sm:$0xff] (!%p338_p2), %vm387_vm1, %v2125_v7  ;;  %vm512_vm5 = vcmask (!%p338_p2), 220160   ;;  %v1205_v40 = vld [vmem:[%s3009_s5] sm:$0xff] (!%p338_p2)  ;;  %v1206_v41 = vld [vmem:[%s3009_s5 + $0x8] sm:$0xff] (!%p338_p2)  ;;  %vm876_vm6 = vcmask (!%p338_p2), 260096   ;;  %vm1353_vm7 = vcmask (!%p338_p2), 392192  }
   0x8   : > { %391 = vst.msk [vmem:[#allocation2 + $0x10] sm:$0xff] (!%p338_p2), %vm387_vm1, %v2125_v7  ;;  %395 = vst.msk [vmem:[#allocation2 + $0x30] sm:$0xff] (!%p338_p2), %vm387_vm1, %v2125_v7  ;;  %2038 = vmatprep.subr.bf16.mxu0 (!%p338_p2), %v2206_v3  ;;  %v2047_v42 = vpack.c.bf16 (!%p338_p2), %v1206_v41, %v1205_v40  ;;  %v1207_v43 = vld [vmem:[%s3009_s5 + $0x10] sm:$0xff] (!%p338_p2)  ;;  %v1208_v44 = vld [vmem:[%s3009_s5 + $0x18] sm:$0xff] (!%p338_p2)  ;;  %vm1355_vm8 = vcmask (!%p338_p2), 386048   ;;  %vm1580_vm9 = vcmask (!%p338_p2), 1041409  }
   0x9   : > { %397 = vst.msk [vmem:[#allocation2 + $0x40] sm:$0xff] (!%p338_p2), %vm387_vm1, %v2125_v7  ;;  %399 = vst.msk [vmem:[#allocation2 + $0x50] sm:$0xff] (!%p338_p2), %vm387_vm1, %v2125_v7  ;;  %2040 = vmatpush3.bf16.msra.mxu0 (!%p338_p2), %v2206_v3  ;;  %v2051_v45 = vpack.c.bf16 (!%p338_p2), %v1208_v44, %v1207_v43  ;;  %v2448_v46 = vld [vmem:[%s3006_s2] ss:$0 sm:$0xff] (!%p338_p2)  ;;  %vm1583_vm10 = vcmask (!%p338_p2), 1042434   ;;  %vm1586_vm11 = vcmask (!%p338_p2), 1043459  }
   0xa   : > { %401 = vst.msk [vmem:[#allocation2 + $0x60] sm:$0xff] (!%p338_p2), %vm387_vm1, %v2125_v7  ;;  %403 = vst.msk [vmem:[#allocation2 + $0x70] sm:$0xff] (!%p338_p2), %vm387_vm1, %v2125_v7  ;;  %2043 = vmatprep.subr.msk.bf16.mxu0 (!%p338_p2), %vm2213_vm3, %v2211_v5  ;;  %2048 = vmatprep.subr.bf16.mxu1 (!%p338_p2), %v2047_v42  ;;  %s2126_s26 = smov (!%p338_p2), 16   ;;  %s2128_s28 = smov (!%p338_p2), 96   ;;  %vm1619_vm12 = vcmask (!%p338_p2), 785408   ;;  %vm1621_vm13 = vcmask (!%p338_p2), 130048  }
   0xb   : > { %405 = vst.msk [vmem:[#allocation2 + $0x80] sm:$0xff] (!%p338_p2), %vm387_vm1, %v2125_v7  ;;  %411 = vst.msk [vmem:[#allocation2 + $0xb0] sm:$0xff] (!%p338_p2), %vm387_vm1, %v2125_v7  ;;  %2050 = vmatpush3.bf16.msra.mxu1 (!%p338_p2), %v2047_v42  ;;  %vm1683_vm14 = vcmask (!%p338_p2), 523264  }
   0xc   : > { %413 = vst.msk [vmem:[#allocation2 + $0xc0] sm:$0xff] (!%p338_p2), %vm387_vm1, %v2125_v7  ;;  %415 = vst.msk [vmem:[#allocation2 + $0xd0] sm:$0xff] (!%p338_p2), %vm387_vm1, %v2125_v7  ;;  %2052 = vmatprep.subr.bf16.mxu1 (!%p338_p2), %v2051_v45 }
   0xd   : > { %s3019_s18 = smov (!%p377_p3, %s1820_s18), 1  ;;  %417 = vst.msk [vmem:[#allocation2 + $0xe0] sm:$0xff] %vm387_vm1, %v2125_v7  ;;  %419 = vst.msk [vmem:[#allocation2 + $0xf0] sm:$0xff] %vm387_vm1, %v2125_v7  ;;  %2046 = vmatpush3.bf16.msk.msra.mxu0 %vm2213_vm3, %v2211_v5 }
   0xe   : > { %421 = vst.msk [vmem:[#allocation2 + $0x100] sm:$0xff] %vm387_vm1, %v2125_v7  ;;  %423 = vst.msk [vmem:[#allocation2 + $0x110] sm:$0xff] %vm387_vm1, %v2125_v7  ;;  %s1911_s27 = sshll.u32 %s3019_s18, 8  ;;  %s1912_s12 = sshll.u32 %s3019_s18, 3 }
   0xf   : > { %425 = vst.msk [vmem:[#allocation2 + $0x120] sm:$0xff] %vm387_vm1, %v2125_v7  ;;  %429 = vst.msk [vmem:[#allocation2 + $0x140] sm:$0xff] %vm387_vm1, %v2125_v7  ;;  %s2364_s30 = scalar_lea.vmem %s3004_s0, %s1911_s27  ;;  %2054 = vmatpush3.bf16.msra.mxu1 %v2051_v45  ;;  %s2127_s27 = smov 48  }
  0x10   : > { %431 = vst.msk [vmem:[#allocation2 + $0x150] sm:$0xff] %vm387_vm1, %v2125_v7  ;;  %433 = vst.msk [vmem:[#allocation2 + $0x160] sm:$0xff] %vm387_vm1, %v2125_v7  ;;  %v469_v8 = vld [vmem:[%s2364_s30] sm:$0xff]  ;;  %v470_v9 = vld [vmem:[%s2364_s30 + $0x8] sm:$0xff]  ;;  %s386_s15 = scalar_lea.vmem %s3015_s11, %s1912_s12 }
  0x11   : > { %435 = vst.msk [vmem:[#allocation2 + $0x170] sm:$0xff] %vm387_vm1, %v2125_v7  ;;  %437 = vst.msk [vmem:[#allocation2 + $0x180] sm:$0xff] %vm387_vm1, %v2125_v7  ;;  %1969 = vmatprep.mubr.msk.f32.mxu0 %vm512_vm5, %v469_v8  ;;  %v471_v10 = vld [vmem:[%s2364_s30 + $0x10] sm:$0xff]  ;;  %v472_v11 = vld [vmem:[%s2364_s30 + $0x18] sm:$0xff] }
  0x12   : > { %439 = vst.msk [vmem:[#allocation2 + $0x190] sm:$0xff] %vm387_vm1, %v2125_v7  ;;  %441 = vst.msk [vmem:[#allocation2 + $0x1a0] sm:$0xff] %vm387_vm1, %v2125_v7  ;;  %1970 = vmatmul.mubr.msk.f32.vlgmr.msra.gmra.mrb[0].mxu0 %vm512_vm5, %v470_v9  ;;  %v473_v12 = vld [vmem:[%s2364_s30 + $0x20] sm:$0xff]  ;;  %v474_v13 = vld [vmem:[%s2364_s30 + $0x28] sm:$0xff] }
  0x13   : > { %443 = vst.msk [vmem:[#allocation2 + $0x1b0] sm:$0xff] %vm387_vm1, %v2125_v7  ;;  %445 = vst.msk [vmem:[#allocation2 + $0x1c0] sm:$0xff] %vm387_vm1, %v2125_v7  ;;  %1972 = vmatprep.mubr.msk.f32.mxu0 %vm512_vm5, %v471_v10  ;;  %v475_v14 = vld [vmem:[%s2364_s30 + $0x30] sm:$0xff]  ;;  %v476_v15 = vld [vmem:[%s2364_s30 + $0x38] sm:$0xff] }
  0x14   : > { %449 = vst.msk [vmem:[#allocation2 + $0x1e0] sm:$0xff] %vm387_vm1, %v2125_v7  ;;  %451 = vst.msk [vmem:[#allocation2 + $0x1f0] sm:$0xff] %vm387_vm1, %v2125_v7  ;;  %v477_v16 = vld [vmem:[%s2364_s30 + $0x40] sm:$0xff]  ;;  %v478_v17 = vld [vmem:[%s2364_s30 + $0x48] sm:$0xff] }
  0x15   : > { %453 = vst.msk [vmem:[#allocation2 + $0x200] sm:$0xff] %vm387_vm1, %v2125_v7  ;;  %455 = vst.msk [vmem:[#allocation2 + $0x210] sm:$0xff] %vm387_vm1, %v2125_v7  ;;  %v479_v18 = vld [vmem:[%s2364_s30 + $0x50] sm:$0xff]  ;;  %v480_v19 = vld [vmem:[%s2364_s30 + $0x58] sm:$0xff] }
  0x16   : > { %457 = vst.msk [vmem:[#allocation2 + $0x220] sm:$0xff] %vm387_vm1, %v2125_v7  ;;  %459 = vst.msk [vmem:[#allocation2 + $0x230] sm:$0xff] %vm387_vm1, %v2125_v7  ;;  %1973 = vmatmul.mubr.msk.f32.gmra.mrb[2].mxu0 %vm512_vm5, %v472_v11  ;;  %v481_v20 = vld [vmem:[%s2364_s30 + $0x60] sm:$0xff]  ;;  %v482_v21 = vld [vmem:[%s2364_s30 + $0x68] sm:$0xff] }
  0x17   : > { %461 = vst.msk [vmem:[#allocation2 + $0x240] sm:$0xff] %vm387_vm1, %v2125_v7  ;;  %463 = vst.msk [vmem:[#allocation2 + $0x250] sm:$0xff] %vm387_vm1, %v2125_v7  ;;  %1975 = vmatprep.mubr.msk.f32.mxu0 %vm512_vm5, %v473_v12  ;;  %v483_v22 = vld [vmem:[%s2364_s30 + $0x70] sm:$0xff]  ;;  %v484_v23 = vld [vmem:[%s2364_s30 + $0x78] sm:$0xff] }
  0x18   : > { %465 = vst.msk [vmem:[#allocation2 + $0x260] sm:$0xff] %vm387_vm1, %v2125_v7  ;;  %v485_v24 = vld [vmem:[%s2364_s30 + $0x80] sm:$0xff]  ;;  %v486_v25 = vld [vmem:[%s2364_s30 + $0x88] sm:$0xff]  ;;  %v487_v26 = vld [vmem:[%s2364_s30 + $0x90] sm:$0xff] }
  0x19   : > { %394 = vst.msk [vmem:[#allocation2 + $0x28] sm:$0x3] %vm389_vm4, %v2125_v7  ;;  %392 = vst.msk [vmem:[#allocation2 + $0x18] sm:$0x3] %vm389_vm4, %v2125_v7  ;;  %v488_v27 = vld [vmem:[%s2364_s30 + $0x98] sm:$0xff]  ;;  %v489_v28 = vld [vmem:[%s2364_s30 + $0xa0] sm:$0xff] }
  0x1a   : > { %396 = vst.msk [vmem:[#allocation2 + $0x38] sm:$0x3] %vm389_vm4, %v2125_v7  ;;  %398 = vst.msk [vmem:[#allocation2 + $0x48] sm:$0x3] %vm389_vm4, %v2125_v7  ;;  %1976 = vmatmul.mubr.msk.f32.gmra.mrb[4].mxu0 %vm512_vm5, %v474_v13  ;;  %v490_v29 = vld [vmem:[%s2364_s30 + $0xa8] sm:$0xff]  ;;  %v491_v30 = vld [vmem:[%s2364_s30 + $0xb0] sm:$0xff] }
  0x1b   : > { %400 = vst.msk [vmem:[#allocation2 + $0x58] sm:$0x3] %vm389_vm4, %v2125_v7  ;;  %402 = vst.msk [vmem:[#allocation2 + $0x68] sm:$0x3] %vm389_vm4, %v2125_v7  ;;  %1978 = vmatprep.mubr.msk.f32.mxu0 %vm512_vm5, %v475_v14  ;;  %v492_v31 = vld [vmem:[%s2364_s30 + $0xb8] sm:$0xff]  ;;  %v493_v32 = vld [vmem:[%s2364_s30 + $0xc0] sm:$0xff] }
  0x1c   : > { %404 = vst.msk [vmem:[#allocation2 + $0x78] sm:$0x3] %vm389_vm4, %v2125_v7  ;;  %406 = vst.msk [vmem:[#allocation2 + $0x88] sm:$0x3] %vm389_vm4, %v2125_v7  ;;  %v494_v33 = vld [vmem:[%s2364_s30 + $0xc8] sm:$0xff]  ;;  %v495_v34 = vld [vmem:[%s2364_s30 + $0xd0] sm:$0xff] }
  0x1d   : > { %412 = vst.msk [vmem:[#allocation2 + $0xb8] sm:$0x3] %vm389_vm4, %v2125_v7  ;;  %414 = vst.msk [vmem:[#allocation2 + $0xc8] sm:$0x3] %vm389_vm4, %v2125_v7  ;;  %v496_v35 = vld [vmem:[%s2364_s30 + $0xd8] sm:$0xff]  ;;  %v497_v36 = vld [vmem:[%s2364_s30 + $0xe0] sm:$0xff] }
  0x1e   : > { %416 = vst.msk [vmem:[#allocation2 + $0xd8] sm:$0x3] %vm389_vm4, %v2125_v7  ;;  %418 = vst.msk [vmem:[#allocation2 + $0xe8] sm:$0x3] %vm389_vm4, %v2125_v7  ;;  %1979 = vmatmul.mubr.msk.f32.gmra.mrb[6].mxu0 %vm512_vm5, %v476_v15  ;;  %v498_v37 = vld [vmem:[%s2364_s30 + $0xe8] sm:$0xff]  ;;  %v499_v38 = vld [vmem:[%s2364_s30 + $0xf0] sm:$0xff] }
  0x1f   : > { %420 = vst.msk [vmem:[#allocation2 + $0xf8] sm:$0x3] %vm389_vm4, %v2125_v7  ;;  %422 = vst.msk [vmem:[#allocation2 + $0x108] sm:$0x3] %vm389_vm4, %v2125_v7  ;;  %1981 = vmatprep.mubr.msk.f32.mxu0 %vm512_vm5, %v477_v16  ;;  %v500_v39 = vld [vmem:[%s2364_s30 + $0xf8] sm:$0xff] }
  0x20   : > { %424 = vst.msk [vmem:[#allocation2 + $0x118] sm:$0x3] %vm389_vm4, %v2125_v7  ;;  %426 = vst.msk [vmem:[#allocation2 + $0x128] sm:$0x3] %vm389_vm4, %v2125_v7 }
  0x21   : > { %430 = vst.msk [vmem:[#allocation2 + $0x148] sm:$0x3] %vm389_vm4, %v2125_v7  ;;  %432 = vst.msk [vmem:[#allocation2 + $0x158] sm:$0x3] %vm389_vm4, %v2125_v7 }
  0x22   : > { %434 = vst.msk [vmem:[#allocation2 + $0x168] sm:$0x3] %vm389_vm4, %v2125_v7  ;;  %436 = vst.msk [vmem:[#allocation2 + $0x178] sm:$0x3] %vm389_vm4, %v2125_v7  ;;  %1982 = vmatmul.mubr.msk.f32.gmra.mrb[8].mxu0 %vm512_vm5, %v478_v17 }
  0x23   : > { %438 = vst.msk [vmem:[#allocation2 + $0x188] sm:$0x3] %vm389_vm4, %v2125_v7  ;;  %440 = vst.msk [vmem:[#allocation2 + $0x198] sm:$0x3] %vm389_vm4, %v2125_v7  ;;  %1984 = vmatprep.mubr.msk.f32.mxu0 %vm512_vm5, %v479_v18 }
  0x24   : > { %442 = vst.msk [vmem:[#allocation2 + $0x1a8] sm:$0x3] %vm389_vm4, %v2125_v7  ;;  %444 = vst.msk [vmem:[#allocation2 + $0x1b8] sm:$0x3] %vm389_vm4, %v2125_v7 }
  0x25   : > { %446 = vst.msk [vmem:[#allocation2 + $0x1c8] sm:$0x3] %vm389_vm4, %v2125_v7  ;;  %450 = vst.msk [vmem:[#allocation2 + $0x1e8] sm:$0x3] %vm389_vm4, %v2125_v7 }
  0x26   : > { %452 = vst.msk [vmem:[#allocation2 + $0x1f8] sm:$0x3] %vm389_vm4, %v2125_v7  ;;  %454 = vst.msk [vmem:[#allocation2 + $0x208] sm:$0x3] %vm389_vm4, %v2125_v7  ;;  %1985 = vmatmul.mubr.msk.f32.gmra.mrb[10].mxu0 %vm512_vm5, %v480_v19 }
  0x27   : > { %456 = vst.msk [vmem:[#allocation2 + $0x218] sm:$0x3] %vm389_vm4, %v2125_v7  ;;  %458 = vst.msk [vmem:[#allocation2 + $0x228] sm:$0x3] %vm389_vm4, %v2125_v7  ;;  %1987 = vmatprep.mubr.msk.f32.mxu0 %vm512_vm5, %v481_v20 }
  0x28   : > { %460 = vst.msk [vmem:[#allocation2 + $0x238] sm:$0x3] %vm389_vm4, %v2125_v7  ;;  %462 = vst.msk [vmem:[#allocation2 + $0x248] sm:$0x3] %vm389_vm4, %v2125_v7 }
  0x29   : > { %464 = vst.msk [vmem:[#allocation2 + $0x258] sm:$0x3] %vm389_vm4, %v2125_v7  ;;  %466 = vst.msk [vmem:[#allocation2 + $0x268] sm:$0x3] %vm389_vm4, %v2125_v7 }
  0x2a   : > { %1988 = vmatmul.mubr.msk.f32.gmra.mrb[12].mxu0 %vm512_vm5, %v482_v21  ;;  %1356 = vst.msk [vmem:[#allocation3 + $0x8] sm:$0x3] %vm1355_vm8, %v2125_v7  ;;  %1360 = vst.msk [vmem:[#allocation3 + $0x28] sm:$0x3] %vm1355_vm8, %v2125_v7 }
  0x2b   : > { %1990 = vmatprep.mubr.msk.f32.mxu0 %vm512_vm5, %v483_v22  ;;  %1359 = vst.msk [vmem:[#allocation3 + $0x20] sm:$0xff] %vm1353_vm7, %v2125_v7  ;;  %1354 = vst.msk [vmem:[#allocation3] sm:$0xff] %vm1353_vm7, %v2125_v7 }
  0x2c   : > { %1357 = vst.msk [vmem:[#allocation3 + $0x10] sm:$0xff] %vm1353_vm7, %v2125_v7  ;;  %1361 = vst.msk [vmem:[#allocation3 + $0x30] sm:$0xff] %vm1353_vm7, %v2125_v7 }
  0x2d   : > { %1358 = vst.msk [vmem:[#allocation3 + $0x18] sm:$0x3] %vm1355_vm8, %v2125_v7  ;;  %1362 = vst.msk [vmem:[#allocation3 + $0x38] sm:$0x3] %vm1355_vm8, %v2125_v7 }
  0x2e   : > { %1991 = vmatmul.mubr.msk.f32.gmra.mrb[14].mxu0 %vm512_vm5, %v484_v23  ;;  %1363 = vst.msk [vmem:[#allocation3 + $0x40] sm:$0xff] %vm1353_vm7, %v2125_v7  ;;  %1365 = vst.msk [vmem:[#allocation3 + $0x50] sm:$0xff] %vm1353_vm7, %v2125_v7 }
  0x2f   : > { %1993 = vmatprep.mubr.msk.f32.mxu0 %vm512_vm5, %v485_v24  ;;  %1364 = vst.msk [vmem:[#allocation3 + $0x48] sm:$0x3] %vm1355_vm8, %v2125_v7  ;;  %1366 = vst.msk [vmem:[#allocation3 + $0x58] sm:$0x3] %vm1355_vm8, %v2125_v7 }
  0x30   : > { %1367 = vst.msk [vmem:[#allocation3 + $0x60] sm:$0xff] %vm1353_vm7, %v2125_v7  ;;  %1369 = vst.msk [vmem:[#allocation3 + $0x70] sm:$0xff] %vm1353_vm7, %v2125_v7 }
  0x31   : > { %1368 = vst.msk [vmem:[#allocation3 + $0x68] sm:$0x3] %vm1355_vm8, %v2125_v7  ;;  %1370 = vst.msk [vmem:[#allocation3 + $0x78] sm:$0x3] %vm1355_vm8, %v2125_v7 }
  0x32   : > { %1994 = vmatmul.mubr.msk.f32.gmra.mrb[16].mxu0 %vm512_vm5, %v486_v25  ;;  %1371 = vst.msk [vmem:[#allocation3 + $0x80] sm:$0xff] %vm1353_vm7, %v2125_v7 }
  0x33   : > { %1996 = vmatprep.mubr.msk.f32.mxu0 %vm512_vm5, %v487_v26  ;;  %1372 = vst.msk [vmem:[#allocation3 + $0x88] sm:$0x3] %vm1355_vm8, %v2125_v7  ;;  %v1628_v7 = vld [vmem:[%s3013_s9 + $0x28] sm:$0xff] }
  0x36   : > { %1997 = vmatmul.mubr.msk.f32.gmra.mrb[18].mxu0 %vm512_vm5, %v488_v27 }
  0x37   : > { %1999 = vmatprep.mubr.msk.f32.mxu0 %vm512_vm5, %v489_v28 }
  0x3a   : > { %2000 = vmatmul.mubr.msk.f32.gmra.mrb[20].mxu0 %vm512_vm5, %v490_v29 }
  0x3b   : > { %2002 = vmatprep.mubr.msk.f32.mxu0 %vm512_vm5, %v491_v30 }
  0x3e   : > { %2003 = vmatmul.mubr.msk.f32.gmra.mrb[22].mxu0 %vm512_vm5, %v492_v31 }
  0x3f   : > { %2005 = vmatprep.mubr.msk.f32.mxu0 %vm512_vm5, %v493_v32 }
  0x42   : > { %2006 = vmatmul.mubr.msk.f32.gmra.mrb[24].mxu0 %vm512_vm5, %v494_v33 }
  0x43   : > { %2008 = vmatprep.mubr.msk.f32.mxu0 %vm512_vm5, %v495_v34 }
  0x46   : > { %2009 = vmatmul.mubr.msk.f32.gmra.mrb[26].mxu0 %vm512_vm5, %v496_v35  ;;  %v902_v35 = vld [vmem:[#allocation2 + $0x1e0] sm:$0xff] }
  0x47   : > { %2011 = vmatprep.mubr.msk.f32.mxu0 %vm512_vm5, %v497_v36 }
  0x4a   : > { %2012 = vmatmul.mubr.msk.f32.gmra.mrb[28].mxu0 %vm512_vm5, %v498_v37  ;;  %v2487_v37 = vld [vmem:[%s3007_s3] ss:$0 sm:$0xff] }
  0x4b   : > { %2014 = vmatprep.mubr.msk.f32.mxu0 %vm512_vm5, %v499_v38  ;;  %v926_v38 = vld [vmem:[#allocation2 + $0x141] sm:$0xff]  ;;  %v917_v45 = vmul.f32 %v2487_v37, %v902_v35 }
  0x4e   : > { %2015 = vmatmul.mubr.msk.f32.gmra.mrb[30].mxu0 %vm512_vm5, %v500_v39  ;;  %v2492_v39 = vld [vmem:[%s3007_s3 + $0x1] ss:$0 sm:$0xff] }
  0xe5   : > { %v1971_v47 = vpop.f32.mrb[0].mxu0 }
  0xe6   : > { %v685_v48 = vadd.f32 %v1971_v47, %v2448_v46  ;;  %v679_v49 = vpop.f32.mrb[1].mxu0  ;;  %v942_v47 = vmul.f32 %v2492_v39, %v926_v38 }
  0xe7   : > { %v680_v50 = vadd.f32 %v2448_v46, %v679_v49  ;;  %v958_v49 = vld [vmem:[#allocation2 + $0x1e1] sm:$0xff] }
  0xe8   : > { %v837_v51 = vmax.f32 %v685_v48, 0.0 }
  0xe9   : > { %v836_v52 = vmax.f32 %v680_v50, 0.0  ;;  %v1974_v53 = vpop.f32.mrb[2].mxu0  ;;  %v2503_v50 = vld [vmem:[%s3007_s3 + $0x2] ss:$0 sm:$0xff] }
  0xea   : > { %868 = vst.msk [vmem:[#allocation2 + $0x21] sm:$0xff] %vm387_vm1, %v837_v51  ;;  %v695_v54 = vadd.f32 %v1974_v53, %v2448_v46  ;;  %v689_v55 = vpop.f32.mrb[3].mxu0 }
  0xeb   : > { %867 = vst.msk [vmem:[#allocation2 + $0x11] sm:$0xff] %vm387_vm1, %v836_v52  ;;  %v690_v56 = vadd.f32 %v2448_v46, %v689_v55 }
  0xec   : > { %v839_v57 = vmax.f32 %v695_v54, 0.0 }
  0xed   : > { %v838_v58 = vmax.f32 %v690_v56, 0.0  ;;  %v1977_v59 = vpop.f32.mrb[4].mxu0  ;;  %v950_v56 = vadd.f32 %v942_v47, %v917_v45  ;;  %v2555_v47 = vld [vmem:[%s3007_s3 + $0x7] ss:$0 sm:$0xff] }
  0xee   : > { %870 = vst.msk [vmem:[#allocation2 + $0x41] sm:$0xff] %vm387_vm1, %v839_v57  ;;  %v705_v60 = vadd.f32 %v1977_v59, %v2448_v46  ;;  %v699_v61 = vpop.f32.mrb[5].mxu0  ;;  %v974_v57 = vmul.f32 %v2503_v50, %v958_v49 }
  0xef   : > { %869 = vst.msk [vmem:[#allocation2 + $0x31] sm:$0xff] %vm387_vm1, %v838_v58  ;;  %v700_v62 = vadd.f32 %v2448_v46, %v699_v61 }
  0xf0   : > { %v841_v63 = vmax.f32 %v705_v60, 0.0  ;;  %v2513_v60 = vld [vmem:[%s3007_s3 + $0x3] ss:$0 sm:$0xff] }
  0xf1   : > { %v840_v0 = vmax.f32 %v700_v62, 0.0  ;;  %v1980_v1 = vpop.f32.mrb[6].mxu0 }
  0xf2   : > { %872 = vst.msk [vmem:[#allocation2 + $0x61] sm:$0xff] %vm387_vm1, %v841_v63  ;;  %v715_v2 = vadd.f32 %v1980_v1, %v2448_v46  ;;  %v709_v3 = vpop.f32.mrb[7].mxu0  ;;  %v982_v1 = vadd.f32 %v974_v57, %v950_v56 }
  0xf3   : > { %871 = vst.msk [vmem:[#allocation2 + $0x51] sm:$0xff] %vm387_vm1, %v840_v0  ;;  %v710_v4 = vadd.f32 %v2448_v46, %v709_v3 }
  0xf4   : > { %v843_v5 = vmax.f32 %v715_v2, 0.0 }
  0xf5   : > { %v842_v6 = vmax.f32 %v710_v4, 0.0  ;;  %v1983_v8 = vpop.f32.mrb[8].mxu0 }
  0xf6   : > { %874 = vst.msk [vmem:[#allocation2 + $0x81] sm:$0xff] %vm387_vm1, %v843_v5  ;;  %v725_v9 = vadd.f32 %v1983_v8, %v2448_v46  ;;  %v719_v10 = vpop.f32.mrb[9].mxu0  ;;  %v1871_v8 = vld [vmem:[%s3007_s3 + $0x4] ss:$0 sm:$0xff] }
  0xf7   : > { %873 = vst.msk [vmem:[#allocation2 + $0x71] sm:$0xff] %vm387_vm1, %v842_v6  ;;  %v720_v11 = vadd.f32 %v2448_v46, %v719_v10  ;;  %v1022_v6 = vld [vmem:[#allocation2 + $0x11] sm:$0xff] }
  0xf8   : > { %v845_v12 = vmax.f32 %v725_v9, 0.0  ;;  %v1093_v9 = vld [vmem:[#allocation2 + $0x260] sm:$0xff] }
  0xf9   : > { %v844_v13 = vmax.f32 %v720_v11, 0.0  ;;  %v1986_v14 = vpop.f32.mrb[10].mxu0 }
  0xfa   : > { %878 = vst.msk [vmem:[#allocation2 + $0xc1] sm:$0x7f] %vm876_vm6, %v845_v12  ;;  %v735_v15 = vadd.f32 %v1986_v14, %v2448_v46  ;;  %v729_v16 = vpop.f32.mrb[11].mxu0  ;;  %v1024_v14 = vld [vmem:[#allocation2 + $0x31] sm:$0xff] }
  0xfb   : > { %877 = vst.msk [vmem:[#allocation2 + $0xb1] sm:$0x7f] %vm876_vm6, %v844_v13  ;;  %v730_v17 = vadd.f32 %v2448_v46, %v729_v16  ;;  %v1023_v13 = vld [vmem:[#allocation2 + $0x21] sm:$0xff] }
  0xfc   : > { %v847_v18 = vmax.f32 %v735_v15, 0.0  ;;  %v1025_v15 = vld [vmem:[#allocation2 + $0x41] sm:$0xff] }
  0xfd   : > { %v846_v19 = vmax.f32 %v730_v17, 0.0  ;;  %v1989_v20 = vpop.f32.mrb[12].mxu0  ;;  %v2528_v17 = vld [vmem:[%s3007_s3 + $0x5] ss:$0 sm:$0xff] }
  0xfe   : > { %880 = vst.msk [vmem:[#allocation2 + $0xe1] sm:$0x7f] %vm876_vm6, %v847_v18  ;;  %v745_v21 = vadd.f32 %v1989_v20, %v2448_v46  ;;  %v739_v22 = vpop.f32.mrb[13].mxu0  ;;  %v2533_v18 = vld [vmem:[%s3007_s3 + $0x6] ss:$0 sm:$0xff] }
  0xff   : > { %879 = vst.msk [vmem:[#allocation2 + $0xd1] sm:$0x7f] %vm876_vm6, %v846_v19  ;;  %v740_v23 = vadd.f32 %v2448_v46, %v739_v22  ;;  %v1026_v19 = vld [vmem:[#allocation2 + $0x51] sm:$0xff]  ;;  %v1027_v20 = vld [vmem:[#allocation2 + $0x61] sm:$0xff]  ;;  %v1038_v22 = vmul.f32 %v1871_v8, %v1022_v6 }
 0x100   : > { %v849_v24 = vmax.f32 %v745_v21, 0.0 }
 0x101   : > { %v848_v25 = vmax.f32 %v740_v23, 0.0  ;;  %v1992_v26 = vpop.f32.mrb[14].mxu0  ;;  %v991_v23 = vld [vmem:[#allocation2 + $0xc0] sm:$0xff] }
 0x102   : > { %882 = vst.msk [vmem:[#allocation2 + $0x101] sm:$0x7f] %vm876_vm6, %v849_v24  ;;  %v755_v27 = vadd.f32 %v1992_v26, %v2448_v46  ;;  %v749_v28 = vpop.f32.mrb[15].mxu0  ;;  %v990_v59 = vld [vmem:[#allocation2 + $0xb0] sm:$0xff]  ;;  %v2536_v26 = vmul.f32 %v2533_v18, %v1093_v9 }
 0x103   : > { %881 = vst.msk [vmem:[#allocation2 + $0xf1] sm:$0x7f] %vm876_vm6, %v848_v25  ;;  %v750_v29 = vadd.f32 %v2448_v46, %v749_v28  ;;  %v1006_v2 = vmul.f32 %v2513_v60, %v990_v59  ;;  %v1028_v24 = vld [vmem:[#allocation2 + $0x71] sm:$0xff]  ;;  %v1029_v25 = vld [vmem:[#allocation2 + $0x81] sm:$0xff] }
 0x104   : > { %v851_v30 = vmax.f32 %v755_v27, 0.0 }
 0x105   : > { %v850_v31 = vmax.f32 %v750_v29, 0.0  ;;  %v1995_v32 = vpop.f32.mrb[16].mxu0  ;;  %v1014_v12 = vadd.f32 %v1006_v2, %v982_v1  ;;  %v1054_v29 = vld [vmem:[#allocation2 + $0xb1] sm:$0xff] }
 0x106   : > { %884 = vst.msk [vmem:[#allocation2 + $0x121] sm:$0x7f] %vm876_vm6, %v851_v30  ;;  %v765_v33 = vadd.f32 %v1995_v32, %v2448_v46  ;;  %v759_v34 = vpop.f32.mrb[17].mxu0  ;;  %v2538_v30 = vmul.f32 %v1871_v8, %v1023_v13  ;;  %v2540_v32 = vmul.f32 %v1871_v8, %v1024_v14 }
 0x107   : > { %883 = vst.msk [vmem:[#allocation2 + $0x111] sm:$0x7f] %vm876_vm6, %v850_v31  ;;  %v760_v36 = vadd.f32 %v2448_v46, %v759_v34  ;;  %v1055_v31 = vld [vmem:[#allocation2 + $0xc1] sm:$0xff]  ;;  %v2542_v34 = vmul.f32 %v1871_v8, %v1025_v15  ;;  %v1046_v38 = vadd.f32 %v1038_v22, %v1014_v12 }
 0x108   : > { %v853_v40 = vmax.f32 %v765_v33, 0.0  ;;  %v993_v33 = vld [vmem:[#allocation2 + $0xe0] sm:$0xff]  ;;  %v2566_v56 = vmul.f32 %v2528_v17, %v1055_v31 }
 0x109   : > { %v852_v41 = vmax.f32 %v760_v36, 0.0  ;;  %v1998_v42 = vpop.f32.mrb[18].mxu0  ;;  %v995_v49 = vld [vmem:[#allocation2 + $0x100] sm:$0xff]  ;;  %v2569_v57 = vmul.f32 %v2513_v60, %v993_v33 }
 0x10a   : > { %887 = vst.msk [vmem:[#allocation2 + $0x161] sm:$0xff] %vm387_vm1, %v853_v40  ;;  %v775_v43 = vadd.f32 %v1998_v42, %v2448_v46  ;;  %v769_v44 = vpop.f32.mrb[19].mxu0  ;;  %v992_v40 = vld [vmem:[#allocation2 + $0xd0] sm:$0xff]  ;;  %v1057_v42 = vld [vmem:[#allocation2 + $0xe1] sm:$0xff] }
 0x10b   : > { %886 = vst.msk [vmem:[#allocation2 + $0x151] sm:$0xff] %vm387_vm1, %v852_v41  ;;  %v770_v48 = vadd.f32 %v2448_v46, %v769_v44  ;;  %v1056_v41 = vld [vmem:[#allocation2 + $0xd1] sm:$0xff]  ;;  %v2548_v44 = vmul.f32 %v1871_v8, %v1027_v20  ;;  %v2572_v1 = vmul.f32 %v2513_v60, %v992_v40 }
 0x10c   : > { %v855_v51 = vmax.f32 %v775_v43, 0.0  ;;  %v2546_v43 = vmul.f32 %v1871_v8, %v1026_v19  ;;  %v1058_v59 = vld [vmem:[#allocation2 + $0xf1] sm:$0xff]  ;;  %v2575_v2 = vmul.f32 %v2528_v17, %v1056_v41 }
 0x10d   : > { %v854_v52 = vmax.f32 %v770_v48, 0.0  ;;  %v2001_v53 = vpop.f32.mrb[20].mxu0  ;;  %v2558_v48 = vmul.f32 %v2513_v60, %v991_v23  ;;  %v2594_v19 = vmul.f32 %v2528_v17, %v1058_v59 }
 0x10e   : > { %889 = vst.msk [vmem:[#allocation2 + $0x181] sm:$0xff] %vm387_vm1, %v855_v51  ;;  %v785_v54 = vadd.f32 %v2001_v53, %v2448_v46  ;;  %v779_v55 = vpop.f32.mrb[21].mxu0  ;;  %v1059_v51 = vld [vmem:[#allocation2 + $0x101] sm:$0xff]  ;;  %v2562_v53 = vmul.f32 %v1871_v8, %v1029_v25 }
 0x10f   : > { %888 = vst.msk [vmem:[#allocation2 + $0x171] sm:$0xff] %vm387_vm1, %v854_v52  ;;  %v780_v58 = vadd.f32 %v2448_v46, %v779_v55  ;;  %v2560_v52 = vmul.f32 %v1871_v8, %v1028_v24  ;;  %v1070_v55 = vmul.f32 %v2528_v17, %v1054_v29  ;;  %v2586_v12 = vmul.f32 %v2528_v17, %v1059_v51 }
 0x110   : > { %v857_v61 = vmax.f32 %v785_v54, 0.0 }
 0x111   : > { %v856_v62 = vmax.f32 %v780_v58, 0.0  ;;  %v2004_v63 = vpop.f32.mrb[22].mxu0  ;;  %v994_v58 = vld [vmem:[#allocation2 + $0xf0] sm:$0xff]  ;;  %v1078_v9 = vadd.f32 %v1070_v55, %v1046_v38 }
 0x112   : > { %891 = vst.msk [vmem:[#allocation2 + $0x1a1] sm:$0xff] %vm387_vm1, %v857_v61  ;;  %v789_v0 = vpop.f32.mrb[23].mxu0  ;;  %v997_v61 = vld [vmem:[#allocation2 + $0x120] sm:$0xff] }
 0x113   : > { %890 = vst.msk [vmem:[#allocation2 + $0x191] sm:$0xff] %vm387_vm1, %v856_v62  ;;  %v790_v3 = vadd.f32 %v2448_v46, %v789_v0  ;;  %v1119_v0 = vld [vmem:[#allocation2 + $0x161] sm:$0xff]  ;;  %v2597_v20 = vmul.f32 %v2513_v60, %v997_v61 }
 0x114   : > { %v2600_v22 = vmul.f32 %v2555_v47, %v1119_v0  ;;  %v2628_v61 = vld [vmem:[%s3007_s3 + $0x8] ss:$0 sm:$0xff] }
 0x115   : > { %v858_v4 = vmax.f32 %v790_v3, 0.0  ;;  %v2007_v5 = vpop.f32.mrb[24].mxu0  ;;  %v2578_v3 = vmul.f32 %v2528_v17, %v1057_v42  ;;  %v1121_v15 = vld [vmem:[#allocation2 + $0x181] sm:$0xff] }
 0x116   : > { %v804_v10 = vadd.f32 %v2007_v5, %v2448_v46  ;;  %v798_v11 = vpop.f32.mrb[25].mxu0  ;;  %v1060_v5 = vld [vmem:[#allocation2 + $0x111] sm:$0xff] }
 0x117   : > { %892 = vst.msk [vmem:[#allocation2 + $0x1b1] sm:$0xff] %vm387_vm1, %v858_v4  ;;  %v799_v16 = vadd.f32 %v2448_v46, %v798_v11  ;;  %v996_v4 = vld [vmem:[#allocation2 + $0x110] sm:$0xff]  ;;  %v2583_v11 = vmul.f32 %v2513_v60, %v995_v49  ;;  %v2606_v24 = vmul.f32 %v2528_v17, %v1060_v5  ;;  %v946_v49 = vmul.f32 %v2492_v39, %v1121_v15 }
 0x118   : > { %v860_v21 = vmax.f32 %v804_v10, 0.0  ;;  %v1118_v10 = vld [vmem:[#allocation2 + $0x151] sm:$0xff]  ;;  %v2603_v23 = vmul.f32 %v2513_v60, %v996_v4 }
 0x119   : > { %v859_v27 = vmax.f32 %v799_v16, 0.0  ;;  %v2010_v28 = vpop.f32.mrb[26].mxu0  ;;  %v1120_v14 = vld [vmem:[#allocation2 + $0x171] sm:$0xff]  ;;  %v2591_v16 = vmul.f32 %v2513_v60, %v994_v58  ;;  %v943_v29 = vmul.f32 %v2492_v39, %v1118_v10 }
 0x11a   : > { %895 = vst.msk [vmem:[#allocation2 + $0x201] sm:$0x7f] %vm876_vm6, %v860_v21  ;;  %v814_v35 = vadd.f32 %v2010_v28, %v2448_v46  ;;  %v808_v36 = vpop.f32.mrb[27].mxu0  ;;  %v1134_v28 = vmul.f32 %v2555_v47, %v1118_v10  ;;  %v2614_v42 = vmul.f32 %v2555_v47, %v1120_v14  ;;  %v945_v58 = vmul.f32 %v2492_v39, %v1120_v14  ;;  %v1122_v59 = vld [vmem:[#allocation2 + $0x191] sm:$0xff] }
 0x11b   : > { %894 = vst.msk [vmem:[#allocation2 + $0x1f1] sm:$0x7f] %vm876_vm6, %v859_v27  ;;  %v809_v45 = vadd.f32 %v2448_v46, %v808_v36  ;;  %v1123_v36 = vld [vmem:[#allocation2 + $0x1a1] sm:$0xff] }
 0x11c   : > { %v862_v54 = vmax.f32 %v814_v35, 0.0  ;;  %v944_v35 = vmul.f32 %v2492_v39, %v1119_v0  ;;  %v2632_v0 = vmul.f32 %v2555_v47, %v1123_v36 }
 0x11d   : > { %v861_v62 = vmax.f32 %v809_v45, 0.0  ;;  %v2013_v63 = vpop.f32.mrb[28].mxu0  ;;  %v2617_v45 = vmul.f32 %v2555_v47, %v1121_v15 }
 0x11e   : > { %897 = vst.msk [vmem:[#allocation2 + $0x221] sm:$0x7f] %vm876_vm6, %v862_v54  ;;  %v824_v6 = vadd.f32 %v2013_v63, %v2448_v46  ;;  %v818_v8 = vpop.f32.mrb[29].mxu0  ;;  %v2635_v4 = vld [vmem:[#allocation2 + $0x1b1] sm:$0xff] }
 0x11f   : > { %896 = vst.msk [vmem:[#allocation2 + $0x211] sm:$0x7f] %vm876_vm6, %v861_v62  ;;  %v819_v13 = vadd.f32 %v2448_v46, %v818_v8 }
 0x120   : > { %v864_v21 = vmax.f32 %v824_v6, 0.0 }
 0x121   : > { %v863_v25 = vmax.f32 %v819_v13, 0.0  ;;  %v2016_v27 = vpop.f32.mrb[30].mxu0  ;;  %v1087_v31 = vld [vmem:[#allocation2 + $0x200] sm:$0xff] }
 0x122   : > { %v1151_v33 = vld [vmem:[#allocation2 + $0x201] sm:$0xff]  ;;  %899 = vst.msk [vmem:[#allocation2 + $0x241] sm:$0x7f] %vm876_vm6, %v864_v21  ;;  %v828_v38 = vpop.f32.mrb[31].mxu0  ;;  %v1086_v40 = vld [vmem:[#allocation2 + $0x1f0] sm:$0xff]  ;;  %v919_v41 = vmul.f32 %v2487_v37, %v1087_v31  ;;  %v2640_v27 = vmul.f32 %v2555_v47, %v1122_v59 }
 0x123   : > { %v1150_v60 = vld [vmem:[#allocation2 + $0x1f1] sm:$0xff]  ;;  %898 = vst.msk [vmem:[#allocation2 + $0x231] sm:$0x7f] %vm876_vm6, %v863_v25  ;;  %v829_v51 = vadd.f32 %v2448_v46, %v828_v38  ;;  %v1102_v54 = vmul.f32 %v2533_v18, %v1086_v40  ;;  %v918_v55 = vmul.f32 %v2487_v37, %v1086_v40  ;;  %v976_v63 = vmul.f32 %v2503_v50, %v1151_v33 }
 0x124   : > { %v952_v62 = vadd.f32 %v944_v35, %v919_v41  ;;  %v948_v46 = vmul.f32 %v2492_v39, %v1123_v36  ;;  %v975_v10 = vmul.f32 %v2503_v50, %v1150_v60  ;;  %v947_v35 = vmul.f32 %v2492_v39, %v1122_v59  ;;  %v2650_v41 = vld [vmem:[%s3008_s4] ss:$0 sm:$0xff] }
 0x125   : > { %v865_v5 = vmax.f32 %v829_v51, 0.0  ;;  %v1110_v6 = vadd.f32 %v1102_v54, %v1078_v9  ;;  %v951_v8 = vadd.f32 %v943_v29, %v918_v55  ;;  %v1089_v13 = vld [vmem:[#allocation2 + $0x220] sm:$0xff]  ;;  %v1166_v38 = vmul.f32 %v2628_v61, %v1150_v60 }
 0x126   : > { %v984_v14 = vadd.f32 %v976_v63, %v952_v62  ;;  %v1088_v15 = vld [vmem:[#allocation2 + $0x210] sm:$0xff]  ;;  %v1153_v21 = vld [vmem:[#allocation2 + $0x221] sm:$0xff]  ;;  %v921_v25 = vmul.f32 %v2487_v37, %v1089_v13  ;;  %v949_v40 = vmul.f32 %v2492_v39, %v2635_v4  ;;  %v1103_v51 = vmul.f32 %v2533_v18, %v1087_v31 }
 0x127   : > { %900 = vst.msk [vmem:[#allocation2 + $0x251] sm:$0x7f] %vm876_vm6, %v865_v5  ;;  %v1142_v36 = vadd.f32 %v1134_v28, %v1110_v6  ;;  %v983_v9 = vadd.f32 %v975_v10, %v951_v8  ;;  %v1152_v29 = vld [vmem:[#allocation2 + $0x211] sm:$0xff]  ;;  %v920_v55 = vmul.f32 %v2487_v37, %v1088_v15  ;;  %v1167_v62 = vmul.f32 %v2628_v61, %v1151_v33 }
 0x128   : > { %v1016_v54 = vadd.f32 %v2572_v1, %v984_v14  ;;  %v954_v59 = vadd.f32 %v946_v49, %v921_v25  ;;  %v978_v63 = vmul.f32 %v2503_v50, %v1153_v21  ;;  %v977_v6 = vmul.f32 %v2503_v50, %v1152_v29 }
 0x129   : > { %v1174_v28 = vadd.f32 %v1166_v38, %v1142_v36  ;;  %v1015_v60 = vadd.f32 %v2558_v48, %v983_v9  ;;  %v953_v5 = vadd.f32 %v945_v58, %v920_v55  ;;  %v1105_v8 = vmul.f32 %v2533_v18, %v1089_v13  ;;  %v1091_v25 = vld [vmem:[#allocation2 + $0x240] sm:$0xff] }
 0x12a   : > { %v1048_v39 = vadd.f32 %v2540_v32, %v1016_v54  ;;  %v1090_v31 = vld [vmem:[#allocation2 + $0x230] sm:$0xff]  ;;  %v1169_v14 = vmul.f32 %v2628_v61, %v1153_v21  ;;  %v986_v48 = vadd.f32 %v978_v63, %v954_v59  ;;  %v1104_v36 = vmul.f32 %v2533_v18, %v1088_v15  ;;  %v1155_v38 = vld [vmem:[#allocation2 + $0x241] sm:$0xff] }
 0x12b   : > { %v1154_v10 = vld [vmem:[#allocation2 + $0x231] sm:$0xff]  ;;  %v1189_v1 = vadd.f32 %v2650_v41, %v1174_v28  ;;  %v1047_v49 = vadd.f32 %v2538_v30, %v1015_v60  ;;  %v985_v32 = vadd.f32 %v977_v6, %v953_v5  ;;  %v922_v58 = vmul.f32 %v2487_v37, %v1090_v31 }
 0x12c   : > { %v1080_v33 = vadd.f32 %v2575_v2, %v1048_v39  ;;  %v1018_v54 = vadd.f32 %v2591_v16, %v986_v48  ;;  %v979_v55 = vmul.f32 %v2503_v50, %v1154_v10  ;;  %v923_v28 = vmul.f32 %v2487_v37, %v1091_v25 }
 0x12d   : > { %v1197_v9 = vmax.f32 %v1189_v1, 0.0  ;;  %v1079_v13 = vadd.f32 %v2566_v56, %v1047_v49  ;;  %v1017_v21 = vadd.f32 %v2569_v57, %v985_v32  ;;  %v955_v59 = vadd.f32 %v947_v35, %v922_v58 }
 0x12e   : > { %v1112_v30 = vadd.f32 %v1104_v36, %v1080_v33  ;;  %v1092_v2 = vld [vmem:[#allocation2 + $0x250] sm:$0xff]  ;;  %v1168_v60 = vmul.f32 %v2628_v61, %v1152_v29  ;;  %v1050_v63 = vadd.f32 %v2546_v43, %v1018_v54  ;;  %v980_v56 = vmul.f32 %v2503_v50, %v1155_v38 }
 0x12f   : > { %2025 = vmatprep.mubr.msk.f32.mxu1 %vm387_vm1, %v1197_v9  ;;  %v1111_v15 = vadd.f32 %v1103_v51, %v1079_v13  ;;  %v1049_v39 = vadd.f32 %v2542_v34, %v1017_v21  ;;  %v987_v5 = vadd.f32 %v979_v55, %v955_v59  ;;  %v956_v6 = vadd.f32 %v948_v46, %v923_v28  ;;  %v1156_v57 = vld [vmem:[#allocation2 + $0x251] sm:$0xff]  ;;  %v1125_v21 = vld [vmem:[#allocation2 + $0x1c1] sm:$0xff] }
 0x130   : > { %v1144_v16 = vadd.f32 %v2614_v42, %v1112_v30  ;;  %v1082_v1 = vadd.f32 %v2594_v19, %v1050_v63  ;;  %v1106_v49 = vmul.f32 %v2533_v18, %v1090_v31  ;;  %v924_v51 = vmul.f32 %v2487_v37, %v1092_v2  ;;  %v1157_v59 = vld [vmem:[#allocation2 + $0x261] sm:$0xff] }
 0x131   : > { %v1143_v35 = vadd.f32 %v2600_v22, %v1111_v15  ;;  %v1081_v43 = vadd.f32 %v2578_v3, %v1049_v39  ;;  %v1019_v48 = vadd.f32 %v2583_v11, %v987_v5  ;;  %v988_v33 = vadd.f32 %v980_v56, %v956_v6 }
 0x132   : > { %v1176_v29 = vadd.f32 %v1168_v60, %v1144_v16  ;;  %v1114_v36 = vadd.f32 %v1106_v49, %v1082_v1  ;;  %v957_v34 = vadd.f32 %v949_v40, %v924_v51  ;;  %v981_v46 = vmul.f32 %v2503_v50, %v1156_v57  ;;  %v1625_v49 = vld [vmem:[%s3013_s9 + $0x10] sm:$0xff]  ;;  %v1630_v51 = vld [vmem:[%s3013_s9 + $0x38] sm:$0xff] }
 0x133   : > { %v1175_v42 = vadd.f32 %v1167_v62, %v1143_v35  ;;  %v1113_v22 = vadd.f32 %v1105_v8, %v1081_v43  ;;  %v1051_v19 = vadd.f32 %v2548_v44, %v1019_v48  ;;  %v1020_v31 = vadd.f32 %v2603_v23, %v988_v33  ;;  %v1061_v8 = vld [vmem:[#allocation2 + $0x121] sm:$0xff]  ;;  %v1629_v33 = vld [vmem:[%s3013_s9 + $0x30] sm:$0xff] }
 0x134   : > { %v1191_v32 = vadd.f32 %v2650_v41, %v1176_v29  ;;  %v1146_v58 = vadd.f32 %v2640_v27, %v1114_v36  ;;  %v1170_v3 = vmul.f32 %v2628_v61, %v1154_v10  ;;  %v989_v11 = vadd.f32 %v981_v46, %v957_v34  ;;  %v1623_v35 = vld [vmem:[%s3013_s9] sm:$0xff]  ;;  %v1634_v36 = vld [vmem:[%s3013_s9 + $0x58] sm:$0xff] }
 0x135   : > { %v1190_v37 = vadd.f32 %v2650_v41, %v1175_v42  ;;  %v1145_v62 = vadd.f32 %v2617_v45, %v1113_v22  ;;  %v1083_v40 = vadd.f32 %v2586_v12, %v1051_v19  ;;  %v1107_v50 = vmul.f32 %v2533_v18, %v1091_v25  ;;  %v1627_v48 = vld [vmem:[%s3013_s9 + $0x20] sm:$0xff]  ;;  %v1632_v42 = vld [vmem:[%s3013_s9 + $0x48] sm:$0xff]  ;;  %v1633_v22 = vld [vmem:[%s3013_s9 + $0x50] sm:$0xff] }
 0x136   : > { %v1052_v9 = vadd.f32 %v2560_v52, %v1020_v31  ;;  %v1178_v44 = vadd.f32 %v1170_v3, %v1146_v58  ;;  %v1108_v23 = vmul.f32 %v2533_v18, %v1092_v2  ;;  %v1021_v54 = vadd.f32 %v2597_v20, %v989_v11  ;;  %v1636_v19 = vld [vmem:[%s3013_s9 + $0x68] sm:$0xff]  ;;  %v1638_v31 = vld [vmem:[%s3013_s9 + $0x78] sm:$0xff]  ;;  %v1635_v3 = vld [vmem:[%s3013_s9 + $0x60] sm:$0xff] }
 0x137   : > { %v1198_v13 = vmax.f32 %v1190_v37, 0.0  ;;  %v1199_v55 = vmax.f32 %v1191_v32, 0.0  ;;  %v1177_v27 = vadd.f32 %v1169_v14, %v1145_v62  ;;  %v1115_v30 = vadd.f32 %v1107_v50, %v1083_v40  ;;  %v1631_v32 = vld [vmem:[%s3013_s9 + $0x40] sm:$0xff]  ;;  %v1637_v11 = vld [vmem:[%s3013_s9 + $0x70] sm:$0xff]  ;;  %v1640_v62 = vld [vmem:[%s3013_s9 + $0x88] sm:$0xff] }
 0x138   : > { %v1084_v10 = vadd.f32 %v2606_v24, %v1052_v9  ;;  %v1193_v12 = vadd.f32 %v2650_v41, %v1178_v44  ;;  %v1140_v52 = vmul.f32 %v2555_v47, %v2635_v4  ;;  %v1053_v45 = vadd.f32 %v2562_v53, %v1021_v54  ;;  %v1642_v40 = vld [vmem:[%s3013_s9 + $0x98] sm:$0xff]  ;;  %v1644_v44 = vld [vmem:[%s3013_s9 + $0xa8] sm:$0xff] }
 0x139   : > { %2026 = vmatmul.mubr.msk.f32.vlgmr.msra.gmra.mrb[0].mxu1 %vm387_vm1, %v1198_v13  ;;  %v1077_v25 = vmul.f32 %v2528_v17, %v1061_v8  ;;  %v1192_v18 = vadd.f32 %v2650_v41, %v1177_v27  ;;  %v1147_v20 = vadd.f32 %v2632_v0, %v1115_v30  ;;  %v1171_v24 = vmul.f32 %v2628_v61, %v1155_v38  ;;  %v1639_v8 = vld [vmem:[%s3013_s9 + $0x80] sm:$0xff]  ;;  %v1641_v13 = vld [vmem:[%s3013_s9 + $0x90] sm:$0xff] }
 0x13a   : > { %2028 = vmatprep.mubr.msk.f32.mxu1 %vm387_vm1, %v1199_v55  ;;  %v1116_v14 = vadd.f32 %v1108_v23, %v1084_v10  ;;  %v1141_v2 = vmul.f32 %v2555_v47, %v1125_v21  ;;  %v1172_v53 = vmul.f32 %v2628_v61, %v1156_v57  ;;  %v1201_v63 = vmax.f32 %v1193_v12, 0.0  ;;  %v1646_v23 = vld [vmem:[%s3013_s9 + $0xb8] sm:$0xff]  ;;  %v1643_v27 = vld [vmem:[%s3013_s9 + $0xa0] sm:$0xff]  ;;  %v1645_v30 = vld [vmem:[%s3013_s9 + $0xb0] sm:$0xff] }
 0x13b   : > { %v1085_v28 = vadd.f32 %v1077_v25, %v1053_v45  ;;  %v1200_v15 = vmax.f32 %v1192_v18, 0.0  ;;  %v1179_v60 = vadd.f32 %v1171_v24, %v1147_v20  ;;  %v1173_v56 = vmul.f32 %v2628_v61, %v1157_v59  ;;  %v1624_v61 = vld [vmem:[%s3013_s9 + $0x8] sm:$0xff]  ;;  %v1650_v21 = vld [vmem:[%s3013_s9 + $0xd8] sm:$0xff]  ;;  %v1647_v45 = vld [vmem:[%s3013_s9 + $0xc0] sm:$0xff] }
 0x13c   : > { %v1148_v4 = vadd.f32 %v1140_v52, %v1116_v14  ;;  %v2057_v29 = vpack.c.bf16 %v1625_v49, %v1623_v35  ;;  %v2059_v43 = vpack.c.bf16 %v1630_v51, %v1628_v7  ;;  %v2061_v34 = vpack.c.bf16 %v1629_v33, %v1627_v48  ;;  %v1648_v10 = vld [vmem:[%s3013_s9 + $0xc8] sm:$0xff]  ;;  %v1649_v25 = vld [vmem:[%s3013_s9 + $0xd0] sm:$0xff]  ;;  %v1654_v20 = vld [vmem:[%s3013_s9 + $0xf8] sm:$0xff] }
 0x13d   : > { %v1117_v17 = vadd.f32 %v2536_v26, %v1085_v28  ;;  %2029 = vmatmul.mubr.msk.f32.gmra.mrb[2].mxu1 %vm387_vm1, %v1200_v15  ;;  %v1194_v0 = vadd.f32 %v2650_v41, %v1179_v60  ;;  %v2063_v46 = vpack.c.bf16 %v1634_v36, %v1632_v42  ;;  %v2065_v37 = vpack.c.bf16 %v1633_v22, %v1631_v32  ;;  %v1652_v18 = vld [vmem:[%s3013_s9 + $0xe8] sm:$0xff]  ;;  %v1651_v59 = vld [vmem:[%s3013_s9 + $0xe0] sm:$0xff]  ;;  %v1653_v28 = vld [vmem:[%s3013_s9 + $0xf0] sm:$0xff] }
 0x13e   : > { %v1180_v38 = vadd.f32 %v1172_v53, %v1148_v4  ;;  %2031 = vmatprep.mubr.msk.f32.mxu1 %vm387_vm1, %v1201_v63  ;;  %v2067_v58 = vpack.c.bf16 %v1638_v31, %v1636_v19  ;;  %v2069_v50 = vpack.c.bf16 %v1637_v11, %v1635_v3  ;;  %v2071_v9 = vpack.c.bf16 %v1642_v40, %v1640_v62  ;;  %v1658_v15 = vld [vmem:[%s3013_s9 + $0x118] sm:$0xff]  ;;  %v1655_v53 = vld [vmem:[%s3013_s9 + $0x100] sm:$0xff]  ;;  %v1657_v63 = vld [vmem:[%s3013_s9 + $0x110] sm:$0xff] }
 0x13f   : > { %v1149_v16 = vadd.f32 %v1141_v2, %v1117_v17  ;;  %v1202_v39 = vmax.f32 %v1194_v0, 0.0  ;;  %v2073_v54 = vpack.c.bf16 %v1641_v13, %v1639_v8  ;;  %v2075_v55 = vpack.c.bf16 %v1646_v23, %v1644_v44  ;;  %v1656_v2 = vld [vmem:[%s3013_s9 + $0x108] sm:$0xff]  ;;  %v1881_v35 = vld [vmem:[%s3010_s6] ss:$0 sm:$0xff]  ;;  %v2899_v48 = vld [vmem:[%s3011_s7 + $0x1] ss:$0 sm:$0xff] }
 0x140   : > { %v1195_v47 = vadd.f32 %v2650_v41, %v1180_v38  ;;  %v2077_v12 = vpack.c.bf16 %v1645_v30, %v1643_v27  ;;  %v2079_v52 = vpack.c.bf16 %v1650_v21, %v1648_v10  ;;  %v2081_v24 = vpack.c.bf16 %v1649_v25, %v1647_v45  ;;  %v1660_v17 = vld [vmem:[%s3013_s9 + $0x128] sm:$0xff]  ;;  %v1384_v49 = vld [vmem:[#allocation3] sm:$0xff] }
 0x141   : > { %v1181_v5 = vadd.f32 %v1173_v56, %v1149_v16  ;;  %2032 = vmatmul.mubr.msk.f32.gmra.mrb[4].mxu1 %vm387_vm1, %v1202_v39  ;;  %v2083_v14 = vpack.c.bf16 %v1654_v20, %v1652_v18  ;;  %v2085_v60 = vpack.c.bf16 %v1653_v28, %v1651_v59  ;;  %v2087_v4 = vpack.c.bf16 %v1658_v15, %v1656_v2  ;;  %v1662_v56 = vld [vmem:[%s3013_s9 + $0x138] sm:$0xff]  ;;  %v1659_v16 = vld [vmem:[%s3013_s9 + $0x120] sm:$0xff]  ;;  %v1661_v39 = vld [vmem:[%s3013_s9 + $0x130] sm:$0xff] }
 0x142   : > { %v1203_v6 = vmax.f32 %v1195_v47, 0.0  ;;  %v2089_v0 = vpack.c.bf16 %v1657_v63, %v1655_v53  ;;  %v2091_v38 = vpack.c.bf16 %v1662_v56, %v1660_v17  ;;  %v1664_v47 = vld [vmem:[%s3013_s9 + $0x148] sm:$0xff]  ;;  %v2907_v19 = vld [vmem:[%s3011_s7 + $0x2] ss:$0 sm:$0xff]  ;;  %v2916_v44 = vld [vmem:[%s3011_s7 + $0x3] ss:$0 sm:$0xff] }
 0x143   : > { %v1196_v57 = vadd.f32 %v2650_v41, %v1181_v5  ;;  %v1626_v41 = vld [vmem:[%s3013_s9 + $0x18] sm:$0xff]  ;;  %v1419_v22 = vld [vmem:[#allocation3 + $0x2] sm:$0xff] }
 0x144   : > { %2034 = vmatprep.mubr.msk.f32.mxu1 %vm387_vm1, %v1203_v6  ;;  %v2055_v1 = vpack.c.bf16 %v1626_v41, %v1624_v61  ;;  %v1666_v5 = vld [vmem:[%s3013_s9 + $0x158] sm:$0xff]  ;;  %v2093_v6 = vpack.c.bf16 %v1661_v39, %v1659_v16  ;;  %v1665_v61 = vld [vmem:[%s3013_s9 + $0x150] sm:$0xff]  ;;  %v1431_v62 = vmul.f32 %v2907_v19, %v1419_v22  ;;  %v2927_v20 = vld [vmem:[%s3011_s7 + $0x4] ss:$0 sm:$0xff] }
 0x145   : > { %v1204_v26 = vmax.f32 %v1196_v57, 0.0  ;;  %v2095_v57 = vpack.c.bf16 %v1666_v5, %v1664_v47 }
 0x146   : > { %2056 = vmatprep.subr.bf16.mxu1 %v2055_v1 }
 0x147   : > { %2035 = vmatmul.mubr.msk.f32.gmra.mrb[6].mxu1 %vm387_vm1, %v1204_v26  ;;  %v1663_v26 = vld [vmem:[%s3013_s9 + $0x140] sm:$0xff] }
 0x148   : > { %2058 = vmatpush1.bf16.msra.mxu1 %v2057_v29  ;;  %v2097_v41 = vpack.c.bf16 %v1665_v61, %v1663_v26  ;;  %v2894_v29 = vld [vmem:[%s3011_s7] ss:$0 sm:$0xff] }
 0x149   : > { %2060 = vmatprep.subr.bf16.mxu1 %v2059_v43  ;;  %v1399_v43 = vld [vmem:[#allocation3 + $0x1] sm:$0xff] }
 0x14c   : > { %2062 = vmatpush1.bf16.msra.mxu1 %v2061_v34  ;;  %v1395_v34 = vmul.f32 %v2894_v29, %v1384_v49 }
 0x14d   : > { %2064 = vmatprep.subr.bf16.mxu1 %v2063_v46  ;;  %v1411_v46 = vmul.f32 %v2899_v48, %v1399_v43 }
 0x14f   : > { %v1415_v11 = vadd.f32 %v1411_v46, %v1395_v34 }
 0x150   : > { %2066 = vmatpush1.bf16.msra.mxu1 %v2065_v37 }
 0x151   : > { %2068 = vmatprep.subr.bf16.mxu1 %v2067_v58  ;;  %v1435_v30 = vadd.f32 %v1431_v62, %v1415_v11 }
 0x154   : > { %2070 = vmatpush1.bf16.msra.mxu1 %v2069_v50 }
 0x155   : > { %2072 = vmatprep.subr.bf16.mxu1 %v2071_v9 }
 0x158   : > { %2074 = vmatpush1.bf16.msra.mxu1 %v2073_v54 }
 0x159   : > { %2076 = vmatprep.subr.bf16.mxu1 %v2075_v55 }
 0x15c   : > { %2078 = vmatpush1.bf16.msra.mxu1 %v2077_v12 }
 0x15d   : > { %2080 = vmatprep.subr.bf16.mxu1 %v2079_v52 }
 0x160   : > { %2082 = vmatpush1.bf16.msra.mxu1 %v2081_v24 }
 0x161   : > { %2084 = vmatprep.subr.bf16.mxu1 %v2083_v14 }
 0x164   : > { %2086 = vmatpush1.bf16.msra.mxu1 %v2085_v60 }
 0x165   : > { %2088 = vmatprep.subr.bf16.mxu1 %v2087_v4  ;;  %v2935_v4 = vld [vmem:[%s3011_s7 + $0x5] ss:$0 sm:$0xff] }
 0x168   : > { %2090 = vmatpush1.bf16.msra.mxu1 %v2089_v0 }
 0x169   : > { %2092 = vmatprep.subr.bf16.mxu1 %v2091_v38 }
 0x16c   : > { %2094 = vmatpush1.bf16.msra.mxu1 %v2093_v6 }
 0x16d   : > { %2096 = vmatprep.subr.bf16.mxu1 %v2095_v57 }
 0x170   : > { %2098 = vmatpush1.bf16.msra.mxu1 %v2097_v41  ;;  %v1902_v41 = vld [vmem:[%s3011_s7 + $0x6] ss:$0 sm:$0xff] }
 0x20c   : > { %v2027_v1 = vpop.f32.mrb[0].mxu1 }
 0x20d   : > { %v1312_v7 = vadd.f32 %v2027_v1, %v1881_v35  ;;  %v1306_v51 = vpop.f32.mrb[1].mxu1 }
 0x20e   : > { %v1307_v33 = vadd.f32 %v1881_v35, %v1306_v51 }
 0x20f   : > { %v1346_v42 = vmax.f32 %v1312_v7, 0.0  ;;  %v1904_v7 = vld [vmem:[%s3011_s7 + $0x7] ss:$0 sm:$0xff] }
 0x210   : > { %v1345_v36 = vmax.f32 %v1307_v33, 0.0  ;;  %v2030_v32 = vpop.f32.mrb[2].mxu1 }
 0x211   : > { %1377 = vst.msk [vmem:[#allocation3 + $0x21] sm:$0xff] %vm1353_vm7, %v1346_v42  ;;  %v1322_v31 = vadd.f32 %v2030_v32, %v1881_v35  ;;  %v1316_v37 = vpop.f32.mrb[3].mxu1 }
 0x212   : > { %1376 = vst.msk [vmem:[#allocation3 + $0x11] sm:$0xff] %vm1353_vm7, %v1345_v36  ;;  %v1317_v58 = vadd.f32 %v1881_v35, %v1316_v37 }
 0x213   : > { %v1348_v3 = vmax.f32 %v1322_v31, 0.0 }
 0x214   : > { %v1347_v40 = vmax.f32 %v1317_v58, 0.0  ;;  %v2033_v50 = vpop.f32.mrb[4].mxu1 }
 0x215   : > { %1379 = vst.msk [vmem:[#allocation3 + $0x41] sm:$0xff] %vm1353_vm7, %v1348_v3  ;;  %v1332_v9 = vadd.f32 %v2033_v50, %v1881_v35  ;;  %v1326_v8 = vpop.f32.mrb[5].mxu1 }
 0x216   : > { %1378 = vst.msk [vmem:[#allocation3 + $0x31] sm:$0xff] %vm1353_vm7, %v1347_v40  ;;  %v1327_v13 = vadd.f32 %v1881_v35, %v1326_v8  ;;  %v1906_v40 = vld [vmem:[%s3011_s7 + $0x8] ss:$0 sm:$0xff] }
 0x217   : > { %v1350_v23 = vmax.f32 %v1332_v9, 0.0 }
 0x218   : > { %v1385_v54 = vld [vmem:[#allocation3 + $0x20] sm:$0xff]  ;;  %v1349_v10 = vmax.f32 %v1327_v13, 0.0 }
 0x219   : > { %v1400_v55 = vld [vmem:[#allocation3 + $0x21] sm:$0xff]  ;;  %v1396_v21 = vmul.f32 %v2894_v29, %v1385_v54  ;;  %v1439_v52 = vld [vmem:[#allocation3 + $0x10] sm:$0xff]  ;;  %1381 = vst.msk [vmem:[#allocation3 + $0x61] sm:$0xff] %vm1353_vm7, %v1350_v23  ;;  %v1512_v58 = vmul.f32 %v1902_v41, %v1385_v54 }
 0x21a   : > { %v2918_v27 = vld [vmem:[#allocation3 + $0x22] sm:$0xff]  ;;  %v1412_v12 = vmul.f32 %v2899_v48, %v1400_v55  ;;  %v2036_v45 = vpop.f32.mrb[6].mxu1  ;;  %v1451_v25 = vmul.f32 %v2916_v44, %v1439_v52  ;;  %v1459_v18 = vld [vmem:[#allocation3 + $0x11] sm:$0xff]  ;;  %1380 = vst.msk [vmem:[#allocation3 + $0x51] sm:$0xff] %vm1353_vm7, %v1349_v10  ;;  %v1532_v13 = vmul.f32 %v1904_v7, %v1400_v55 }
 0x21b   : > { %v1342_v24 = vadd.f32 %v2036_v45, %v1881_v35  ;;  %v1336_v14 = vpop.f32.mrb[7].mxu1  ;;  %v1432_v28 = vmul.f32 %v2907_v19, %v2918_v27  ;;  %v1479_v60 = vld [vmem:[#allocation3 + $0x12] sm:$0xff]  ;;  %v1471_v38 = vmul.f32 %v2927_v20, %v1459_v18 }
 0x21c   : > { %v1416_v59 = vadd.f32 %v1412_v12, %v1396_v21  ;;  %v1337_v2 = vadd.f32 %v1881_v35, %v1336_v14  ;;  %v1455_v15 = vadd.f32 %v1451_v25, %v1435_v30  ;;  %v1386_v63 = vld [vmem:[#allocation3 + $0x40] sm:$0xff]  ;;  %v1491_v61 = vmul.f32 %v2935_v4, %v1479_v60 }
 0x21d   : > { %v1352_v53 = vmax.f32 %v1342_v24, 0.0  ;;  %v1401_v17 = vld [vmem:[#allocation3 + $0x41] sm:$0xff]  ;;  %v1397_v39 = vmul.f32 %v2894_v29, %v1386_v63  ;;  %v1440_v5 = vld [vmem:[#allocation3 + $0x30] sm:$0xff]  ;;  %v1513_v54 = vmul.f32 %v1902_v41, %v1386_v63  ;;  %v1552_v12 = vmul.f32 %v1906_v40, %v2918_v27  ;;  %v1907_v27 = vld [vmem:[%s3012_s8] ss:$0 sm:$0xff] }
 0x21e   : > { %v1421_v56 = vld [vmem:[#allocation3 + $0x42] sm:$0xff]  ;;  %v1436_v0 = vadd.f32 %v1432_v28, %v1416_v59  ;;  %v1351_v16 = vmax.f32 %v1337_v2, 0.0  ;;  %v1413_v47 = vmul.f32 %v2899_v48, %v1401_v17  ;;  %v1460_v6 = vld [vmem:[#allocation3 + $0x31] sm:$0xff]  ;;  %v1452_v57 = vmul.f32 %v2916_v44, %v1440_v5 }
 0x21f   : > { %1383 = vst.msk [vmem:[#allocation3 + $0x81] sm:$0xff] %vm1353_vm7, %v1352_v53  ;;  %v1475_v26 = vadd.f32 %v1471_v38, %v1455_v15  ;;  %v1433_v1 = vmul.f32 %v2907_v19, %v1421_v56  ;;  %v1480_v49 = vld [vmem:[#allocation3 + $0x32] sm:$0xff]  ;;  %v1472_v36 = vmul.f32 %v2927_v20, %v1460_v6  ;;  %v1533_v14 = vmul.f32 %v1904_v7, %v1401_v17 }
 0x220   : > { %1382 = vst.msk [vmem:[#allocation3 + $0x71] sm:$0xff] %vm1353_vm7, %v1351_v16  ;;  %v1417_v35 = vadd.f32 %v1413_v47, %v1397_v39  ;;  %v1387_v51 = vld [vmem:[#allocation3 + $0x60] sm:$0xff]  ;;  %v1456_v42 = vadd.f32 %v1452_v57, %v1436_v0  ;;  %v1492_v62 = vmul.f32 %v2935_v4, %v1480_v49  ;;  %v1553_v59 = vmul.f32 %v1906_v40, %v1421_v56 }
 0x221   : > { %v1402_v43 = vld [vmem:[#allocation3 + $0x61] sm:$0xff]  ;;  %v1495_v34 = vadd.f32 %v1491_v61, %v1475_v26  ;;  %v1398_v46 = vmul.f32 %v2894_v29, %v1387_v51  ;;  %v1441_v31 = vld [vmem:[#allocation3 + $0x50] sm:$0xff]  ;;  %v1514_v2 = vmul.f32 %v1902_v41, %v1387_v51 }
 0x222   : > { %v1422_v33 = vld [vmem:[#allocation3 + $0x62] sm:$0xff]  ;;  %v1414_v32 = vmul.f32 %v2899_v48, %v1402_v43  ;;  %v1437_v22 = vadd.f32 %v1433_v1, %v1417_v35  ;;  %v1461_v37 = vld [vmem:[#allocation3 + $0x51] sm:$0xff]  ;;  %v1453_v3 = vmul.f32 %v2916_v44, %v1441_v31  ;;  %v1476_v11 = vadd.f32 %v1472_v36, %v1456_v42 }
 0x223   : > { %v1434_v9 = vmul.f32 %v2907_v19, %v1422_v33  ;;  %v1481_v8 = vld [vmem:[#allocation3 + $0x52] sm:$0xff]  ;;  %v1516_v29 = vadd.f32 %v1512_v58, %v1495_v34  ;;  %v1473_v23 = vmul.f32 %v2927_v20, %v1461_v37  ;;  %v1534_v16 = vmul.f32 %v1904_v7, %v1402_v43  ;;  %v1668_v43 = vld [vmem:[%s3013_s9 + $0x168] sm:$0xff] }
 0x224   : > { %v1418_v50 = vadd.f32 %v1414_v32, %v1398_v46  ;;  %v1457_v48 = vadd.f32 %v1453_v3, %v1437_v22  ;;  %v1496_v30 = vadd.f32 %v1492_v62, %v1476_v11  ;;  %v1493_v18 = vmul.f32 %v2935_v4, %v1481_v8 }
 0x225   : > { %v1536_v21 = vadd.f32 %v1532_v13, %v1516_v29  ;;  %v1554_v5 = vmul.f32 %v1906_v40, %v1422_v33  ;;  %v1667_v33 = vld [vmem:[%s3013_s9 + $0x160] sm:$0xff] }
 0x226   : > { %v1438_v10 = vadd.f32 %v1434_v9, %v1418_v50  ;;  %v1477_v25 = vadd.f32 %v1473_v23, %v1457_v48  ;;  %v1517_v24 = vadd.f32 %v1513_v54, %v1496_v30  ;;  %v1503_v0 = vld [vmem:[#allocation3 + $0x80] sm:$0xff] }
 0x227   : > { %v1442_v52 = vld [vmem:[#allocation3 + $0x70] sm:$0xff]  ;;  %v1556_v60 = vadd.f32 %v1552_v12, %v1536_v21  ;;  %v1523_v56 = vld [vmem:[#allocation3 + $0x81] sm:$0xff]  ;;  %v1515_v61 = vmul.f32 %v1902_v41, %v1503_v0  ;;  %v1673_v0 = vlaneseq }
 0x228   : > { %v1462_v45 = vld [vmem:[#allocation3 + $0x71] sm:$0xff]  ;;  %v1454_v19 = vmul.f32 %v2916_v44, %v1442_v52  ;;  %v1497_v28 = vadd.f32 %v1493_v18, %v1477_v25  ;;  %v1537_v15 = vadd.f32 %v1533_v14, %v1517_v24  ;;  %v1543_v35 = vld [vmem:[#allocation3 + $0x82] sm:$0xff]  ;;  %v1535_v51 = vmul.f32 %v1904_v7, %v1523_v56 }
 0x229   : > { %v1482_v55 = vld [vmem:[#allocation3 + $0x72] sm:$0xff]  ;;  %v1474_v63 = vmul.f32 %v2927_v20, %v1462_v45  ;;  %v1567_v6 = vadd.f32 %v1907_v27, %v1556_v60  ;;  %v1555_v42 = vmul.f32 %v1906_v40, %v1543_v35 }
 0x22a   : > { %v1458_v53 = vadd.f32 %v1454_v19, %v1438_v10  ;;  %v1518_v38 = vadd.f32 %v1514_v2, %v1497_v28  ;;  %v1557_v39 = vadd.f32 %v1553_v59, %v1537_v15  ;;  %v1494_v44 = vmul.f32 %v2935_v4, %v1482_v55  ;;  %v1670_v4 = vld [vmem:[%s3013_s9 + $0x178] sm:$0xff]  ;;  %v1669_v7 = vld [vmem:[%s3013_s9 + $0x170] sm:$0xff] }
 0x22b   : > { %v1571_v41 = vmax.f32 %v1567_v6, 0.0  ;;  %v2099_v32 = vpack.c.bf16 %v1670_v4, %v1668_v43  ;;  %v2101_v22 = vpack.c.bf16 %v1669_v7, %v1667_v33 }
 0x22c   : > { %v1478_v17 = vadd.f32 %v1474_v63, %v1458_v53  ;;  %v1538_v47 = vadd.f32 %v1534_v16, %v1518_v38  ;;  %v1568_v57 = vadd.f32 %v1907_v27, %v1557_v39  ;;  %v1674_v38 = vshrl.u32 %v1673_v0, 7  ;;  %v1671_v39 = vld [vmem:[%s3014_s10] sm:$0x3] }
 0x22d   : > { %2100 = vmatprep.subr.bf16.mxu1 %v2099_v32  ;;  %v1589_v50 = vrot.slane %v1571_v41, 2  ;;  %v1608_v13 = vrot.slane %v1571_v41, 6  ;;  %v1598_v45 = vrot.slane %v1571_v41, 4 }
 0x22e   : > { %v1498_v26 = vadd.f32 %v1494_v44, %v1478_v17  ;;  %v1558_v20 = vadd.f32 %v1554_v5, %v1538_v47  ;;  %v1572_v1 = vmax.f32 %v1568_v57, 0.0  ;;  %2102 = vmatpush1.bf16.msra.mxu1 %v2101_v22  ;;  %v1675_v16 = vsub.s32 0, %v1674_v38 }
 0x22f   : > { %v1679_v17 = vsub.s32 1, %v1674_v38 }
 0x230   : > { %v1519_v49 = vadd.f32 %v1515_v61, %v1498_v26  ;;  %v1569_v36 = vadd.f32 %v1907_v27, %v1558_v20  ;;  %v1579_v46 = vrot.slane %v1572_v1, 7  ;;  %v1590_v58 = vrot.slane %v1572_v1, 1 }
 0x231   : > { %v1609_v40 = vrot.slane %v1572_v1, 5  ;;  %v1599_v23 = vrot.slane %v1572_v1, 3  ;;  %v1676_v44 = vrot.slane %v1671_v39, %v1675_v16  ;;  %v1680_v56 = vrot.slane %v1671_v39, %v1679_v17 }
 0x232   : > { %v1539_v34 = vadd.f32 %v1535_v51, %v1519_v49  ;;  %v1573_v31 = vmax.f32 %v1569_v36, 0.0  ;;  %v1581_v3 = vsel %vm1580_vm9, %v1579_v46, %v1571_v41  ;;  %v1591_v48 = vsel %vm1580_vm9, %v1590_v58, %v1589_v50 }
 0x233   : > { %v1610_v30 = vsel %vm1580_vm9, %v1609_v40, %v1608_v13  ;;  %v1600_v59 = vsel %vm1580_vm9, %v1599_v23, %v1598_v45 }
 0x234   : > { %v1559_v37 = vadd.f32 %v1555_v42, %v1539_v34  ;;  %v1582_v11 = vrot.slane %v1573_v31, 6  ;;  %v1611_v9 = vrot.slane %v1573_v31, 4  ;;  %v1592_v52 = vsel %vm1583_vm10, %v1573_v31, %v1591_v48 }
 0x235   : > { %v1601_v25 = vrot.slane %v1573_v31, 2 }
 0x236   : > { %v1570_v62 = vadd.f32 %v1907_v27, %v1559_v37  ;;  %v1584_v8 = vsel %vm1583_vm10, %v1582_v11, %v1581_v3  ;;  %v1612_v12 = vsel %vm1583_vm10, %v1611_v9, %v1610_v30 }
 0x237   : > { %v1602_v55 = vsel %vm1583_vm10, %v1601_v25, %v1600_v59 }
 0x238   : > { %v1574_v29 = vmax.f32 %v1570_v62, 0.0 }
 0x23a   : > { %v1613_v54 = vrot.slane %v1574_v29, 3  ;;  %v1593_v10 = vrot.slane %v1574_v29, 7  ;;  %v1585_v21 = vrot.slane %v1574_v29, 5  ;;  %v1603_v14 = vrot.slane %v1574_v29, 1 }
 0x23c   : > { %v1614_v18 = vsel %vm1586_vm11, %v1613_v54, %v1612_v12  ;;  %v1594_v24 = vsel %vm1586_vm11, %v1593_v10, %v1592_v52  ;;  %v1587_v19 = vsel %vm1586_vm11, %v1585_v21, %v1584_v8  ;;  %v1604_v28 = vsel %vm1586_vm11, %v1603_v14, %v1602_v55 }
 0x23d   : > { %1615 = vrot.lane.b32.xlu1 %v1614_v18, %s2126_s26  ;;  %1595 = vrot.lane.b32.xlu0 %v1594_v24, %s2127_s27 }
 0x241   : > { %1605 = vrot.lane.b32.xlu0 %v1604_v28, %s2128_s28 }
 0x2af   : > { %v1596_v2 = vpop.permute.xlu0 %1595  ;;  %v1616_v15 = vpop.permute.xlu1 %1615 }
 0x2b0   : > { %v1618_v60 = vsel %vm1353_vm7, %v1587_v19, %v1596_v2 }
 0x2b3   : > { %v1606_v53 = vpop.permute.xlu0 %1605 }
 0x2b4   : > { %v1620_v63 = vsel %vm1619_vm12, %v1618_v60, %v1606_v53  ;;  %v1622_v27 = vsel %vm1621_vm13, %v1606_v53, %v1616_v15 }
 0x2b5   : > { %1908 = vmatprep.mubr.msk.f32.mxu1 %vm1683_vm14, %v1622_v27 }
 0x2b6   : > { %1752 = vmatmul.mubr.f32.vlgmr.msra.gmra.mrb[8].mxu1 %v1620_v63 }
 0x389   : > { %v1753_v47 = vpop.f32.mrb[8].mxu1 }
 0x38a   : > { %v1754_v5 = vadd.f32 %v1753_v47, %v1676_v44  ;;  %v1755_v6 = vpop.f32.mrb[9].mxu1 }
 0x38b   : > { %v1756_v57 = vadd.f32 %v1755_v6, %v1680_v56 }
 0x38c   : > { %v1758_v26 = vmax.f32 %v1754_v5, 0.0 }
 0x38d   : > { %v1759_v61 = vmax.f32 %v1756_v57, 0.0 }
 0x38f   : > { %v1762_v35 = vcombine.low %v1758_v26, %v1759_v61 }
 0x391   : > { %1764 = vst [vmem:[%s386_s15] sm:$0xff] %v1762_v35 }
 0x392 PF: > { %s21_s17 = sadd.s32 1, %s2122_s17  }
 0x393   : > { %p18_p4 = scmp.ge.s32.totalorder %s21_s17, 4  }
 0x395   :  { %20 = sbr.rel (!%p18_p4) target bundleno = 1 (0x1), region = 118 }

</bundles_post_ra>
